<compile_context>
chip_gen: v7x
topology: tpu7x:2x2x1
jax: 0.10.0
libtpu: 0.0.40
codegen_flags: <defaults>
</compile_context>

<pallas_src>
import jax
import jax.numpy as jnp
from jax.experimental import pallas as pl
from jax.experimental.pallas import tpu as pltpu

K_IN = 28 * 28        # 784 input features (unpadded in HBM)
H1 = 256
H2 = 64               # real hidden-2 width
H2_PAD = 128          # padded to a full lane group (zero columns)
OUT = 10              # real logits
OUT_PAD = 128         # logits padded to a full lane width


def _round_up(x, m):
    return ((x + m - 1) // m) * m


def mlp_kernel(x_ref, w1_ref, b1_ref, w2_ref, b2_ref, w3_ref, b3_ref, o_ref):
    # Layer 1: (TB, 784)bf16 @ (784, 256)bf16 -> f32 acc, bias + ReLU in f32.
    h1 = jnp.dot(x_ref[...], w1_ref[...], preferred_element_type=jnp.float32)
    h1 = jnp.maximum(h1 + b1_ref[...], 0.0)

    # Layer 2: (TB, 256)bf16 @ (256, 128)bf16 -> f32 (cols 64..127 are zero pad).
    h2 = jnp.dot(h1.astype(jnp.bfloat16), w2_ref[...],
                 preferred_element_type=jnp.float32)
    h2 = jnp.maximum(h2 + b2_ref[...], 0.0)

    # Layer 3: (TB, 128)bf16 @ (128, 128)bf16 -> f32 logits (padded slab).
    out = jnp.dot(h2.astype(jnp.bfloat16), w3_ref[...],
                  preferred_element_type=jnp.float32)
    o_ref[...] = (out + b3_ref[...]).astype(o_ref.dtype)


def net_forward(x, params, *, tb=1024):
    """x: (B, 784) float array. params: dict of bf16 weights / f32 biases."""
    B = x.shape[0]
    # Adaptive tile: keep >=2 grid tiles on modest batches (v7x megacore),
    # keep the tile a multiple of 256, cap at `tb`.
    tb_eff = max(256, min(tb, _round_up(pl.cdiv(B, 2), 256)))
    n_tiles = pl.cdiv(B, tb_eff)
    B_pad = n_tiles * tb_eff

    # Cast once to bf16; only pad the batch rows when needed (no K padding).
    xb = x.astype(jnp.bfloat16)
    if B_pad != B:
        xb = jnp.pad(xb, ((0, B_pad - B), (0, 0)))

    resident = lambda i: (0, 0)   # weights/biases: same block every grid step

    out = pl.pallas_call(
        mlp_kernel,
        out_shape=jax.ShapeDtypeStruct((B_pad, OUT_PAD), jnp.bfloat16),
        grid=(n_tiles,),
        in_specs=[
            pl.BlockSpec((tb_eff, K_IN), lambda i: (i, 0)),   # x tile (784 = full dim)
            pl.BlockSpec((K_IN, H1), resident),               # w1
            pl.BlockSpec((1, H1), resident),                  # b1
            pl.BlockSpec((H1, H2_PAD), resident),             # w2 (lane-padded)
            pl.BlockSpec((1, H2_PAD), resident),              # b2 (lane-padded)
            pl.BlockSpec((H2_PAD, OUT_PAD), resident),        # w3 (padded)
            pl.BlockSpec((1, OUT_PAD), resident),             # b3 (padded)
        ],
        out_specs=pl.BlockSpec((tb_eff, OUT_PAD), lambda i: (i, 0)),
        compiler_params=pltpu.CompilerParams(
            dimension_semantics=("parallel",),
            vmem_limit_bytes=32 * 1024 * 1024),
    )(
        xb,
        params["w1"], params["b1"],
        params["w2"], params["b2"],
        params["w3"], params["b3"],
    )
    # Strip batch / lane padding back to the real logits, return f32.
    return out[:B, :OUT].astype(jnp.float32)


def init_params(key):
    """nn.Linear-style init, stored as (in, out); weights bf16, biases f32.

    w2/b2 are zero-padded along the output dim (64->128) and w3 along its
    input dim (zero rows 64..127) and output dim (10->128), so the padded
    matmuls produce exactly the unpadded result.
    """
    ks = jax.random.split(key, 6)

    def linear(kw, kb, fan_in, fan_out):
        # PyTorch default: U(-1/sqrt(fan_in), 1/sqrt(fan_in))
        bound = 1.0 / jnp.sqrt(jnp.float32(fan_in))
        w = jax.random.uniform(kw, (fan_in, fan_out), jnp.float32, -bound, bound)
        b = jax.random.uniform(kb, (1, fan_out), jnp.float32, -bound, bound)
        return w, b

    w1, b1 = linear(ks[0], ks[1], K_IN, H1)
    w2, b2 = linear(ks[2], ks[3], H1, H2)
    w3, b3 = linear(ks[4], ks[5], H2, OUT)

    # Lane-pad hidden-2 (zero columns) and the logits (zero columns),
    # plus zero rows of w3 matching h2's zero-padded columns.
    w2p = jnp.zeros((H1, H2_PAD), jnp.float32).at[:, :H2].set(w2)
    b2p = jnp.zeros((1, H2_PAD), jnp.float32).at[:, :H2].set(b2)
    w3p = jnp.zeros((H2_PAD, OUT_PAD), jnp.float32).at[:H2, :OUT].set(w3)
    b3p = jnp.zeros((1, OUT_PAD), jnp.float32).at[:, :OUT].set(b3)

    return {
        "w1": w1.astype(jnp.bfloat16), "b1": b1,
        "w2": w2p.astype(jnp.bfloat16), "b2": b2p,
        "w3": w3p.astype(jnp.bfloat16), "b3": b3p,
    }


def net_forward_ref(x, p):
    """Pure-JAX reference mirroring the kernel's bf16-in / f32-accumulate math."""
    h = x.astype(jnp.bfloat16).astype(jnp.float32)
    h = jnp.maximum(h @ p["w1"].astype(jnp.float32) + p["b1"], 0.0)
    h = h.astype(jnp.bfloat16).astype(jnp.float32)
    h = jnp.maximum(h @ p["w2"].astype(jnp.float32) + p["b2"], 0.0)
    h = h.astype(jnp.bfloat16).astype(jnp.float32)
    out = h @ p["w3"].astype(jnp.float32) + p["b3"]
    # Kernel stores logits as bf16; mirror that cast for an apples-to-apples check.
    return out[:, :OUT].astype(jnp.bfloat16).astype(jnp.float32)


if __name__ == "__main__":
    key = jax.random.PRNGKey(0)
    k_param, k_x = jax.random.split(key)

    params = init_params(k_param)
    # Small batch of flattened 28x28 "images".
    B = 8
    x = jax.random.normal(k_x, (B, K_IN), dtype=jnp.float32)

    out = net_forward(x, params)
    out = jax.block_until_ready(out)

    ref = net_forward_ref(x, params)
    assert out.shape == (B, OUT)
    assert jnp.allclose(out, ref, atol=5e-3, rtol=5e-3), "mismatch vs reference"

    print("KERNEL_OK")
</pallas_src>

<mosaic_0001>
module attributes {stable_mosaic.version = 11 : i64} {
  func.func @mlp_kernel(%arg0: i32, %arg1: memref<256x784xbf16, #tpu.memory_space<vmem>>, %arg2: memref<784x256xbf16, #tpu.memory_space<vmem>>, %arg3: memref<1x256xf32, #tpu.memory_space<vmem>>, %arg4: memref<256x128xbf16, #tpu.memory_space<vmem>>, %arg5: memref<1x128xf32, #tpu.memory_space<vmem>>, %arg6: memref<128x128xbf16, #tpu.memory_space<vmem>>, %arg7: memref<1x128xf32, #tpu.memory_space<vmem>>, %arg8: memref<256x128xbf16, #tpu.memory_space<vmem>>) attributes {dimension_semantics = [#tpu.dimension_semantics<parallel>], iteration_bounds = array<i64: 1>, scalar_prefetch = 0 : i64, scratch_operands = 0 : i64, tpu.core_type = #tpu.core_type<tc>, window_params = [{transform_indices = @transform_0, window_bounds = array<i64: 256, 784>}, {pipeline_mode = #tpu.pipeline_mode<synchronous>, transform_indices = @transform_1, window_bounds = array<i64: 784, 256>}, {pipeline_mode = #tpu.pipeline_mode<synchronous>, transform_indices = @transform_2, window_bounds = array<i64: 1, 256>}, {pipeline_mode = #tpu.pipeline_mode<synchronous>, transform_indices = @transform_3, window_bounds = array<i64: 256, 128>}, {pipeline_mode = #tpu.pipeline_mode<synchronous>, transform_indices = @transform_4, window_bounds = array<i64: 1, 128>}, {pipeline_mode = #tpu.pipeline_mode<synchronous>, transform_indices = @transform_5, window_bounds = array<i64: 128, 128>}, {pipeline_mode = #tpu.pipeline_mode<synchronous>, transform_indices = @transform_6, window_bounds = array<i64: 1, 128>}, {transform_indices = @transform_7, window_bounds = array<i64: 256, 128>}]} {
    %c0 = arith.constant 0 : index
    %c0_0 = arith.constant 0 : index
    %0 = vector.load %arg1[%c0, %c0_0] : memref<256x784xbf16, #tpu.memory_space<vmem>>, vector<256x784xbf16>
    %c0_1 = arith.constant 0 : index
    %c0_2 = arith.constant 0 : index
    %1 = vector.load %arg2[%c0_1, %c0_2] : memref<784x256xbf16, #tpu.memory_space<vmem>>, vector<784x256xbf16>
    %cst = arith.constant dense<0.000000e+00> : vector<256x256xf32>
    %2 = tpu.matmul %0, %1, %cst {dimension_numbers = #tpu.dot_dimension_numbers<[1], [0], [0], [1], [0, 0, 1, 1], [], []>} : vector<256x784xbf16>, vector<784x256xbf16>, vector<256x256xf32> -> vector<256x256xf32>
    %c0_3 = arith.constant 0 : index
    %c0_4 = arith.constant 0 : index
    %3 = vector.load %arg3[%c0_3, %c0_4] : memref<1x256xf32, #tpu.memory_space<vmem>>, vector<1x256xf32>
    %4 = vector.broadcast %3 : vector<1x256xf32> to vector<256x256xf32>
    %5 = arith.addf %2, %4 : vector<256x256xf32>
    %cst_5 = arith.constant 0.000000e+00 : f32
    %6 = vector.broadcast %cst_5 : f32 to vector<256x256xf32>
    %7 = arith.maximumf %5, %6 : vector<256x256xf32>
    %8 = arith.truncf %7 : vector<256x256xf32> to vector<256x256xbf16>
    %c0_6 = arith.constant 0 : index
    %c0_7 = arith.constant 0 : index
    %9 = vector.load %arg4[%c0_6, %c0_7] : memref<256x128xbf16, #tpu.memory_space<vmem>>, vector<256x128xbf16>
    %cst_8 = arith.constant dense<0.000000e+00> : vector<256x128xf32>
    %10 = tpu.matmul %8, %9, %cst_8 {dimension_numbers = #tpu.dot_dimension_numbers<[1], [0], [0], [1], [0, 0, 1, 1], [], []>} : vector<256x256xbf16>, vector<256x128xbf16>, vector<256x128xf32> -> vector<256x128xf32>
    %c0_9 = arith.constant 0 : index
    %c0_10 = arith.constant 0 : index
    %11 = vector.load %arg5[%c0_9, %c0_10] : memref<1x128xf32, #tpu.memory_space<vmem>>, vector<1x128xf32>
    %12 = vector.broadcast %11 : vector<1x128xf32> to vector<256x128xf32>
    %13 = arith.addf %10, %12 : vector<256x128xf32>
    %cst_11 = arith.constant 0.000000e+00 : f32
    %14 = vector.broadcast %cst_11 : f32 to vector<256x128xf32>
    %15 = arith.maximumf %13, %14 : vector<256x128xf32>
    %16 = arith.truncf %15 : vector<256x128xf32> to vector<256x128xbf16>
    %c0_12 = arith.constant 0 : index
    %c0_13 = arith.constant 0 : index
    %17 = vector.load %arg6[%c0_12, %c0_13] : memref<128x128xbf16, #tpu.memory_space<vmem>>, vector<128x128xbf16>
    %cst_14 = arith.constant dense<0.000000e+00> : vector<256x128xf32>
    %18 = tpu.matmul %16, %17, %cst_14 {dimension_numbers = #tpu.dot_dimension_numbers<[1], [0], [0], [1], [0, 0, 1, 1], [], []>} : vector<256x128xbf16>, vector<128x128xbf16>, vector<256x128xf32> -> vector<256x128xf32>
    %c0_15 = arith.constant 0 : index
    %c0_16 = arith.constant 0 : index
    %19 = vector.load %arg7[%c0_15, %c0_16] : memref<1x128xf32, #tpu.memory_space<vmem>>, vector<1x128xf32>
    %20 = vector.broadcast %19 : vector<1x128xf32> to vector<256x128xf32>
    %21 = arith.addf %18, %20 : vector<256x128xf32>
    %22 = arith.truncf %21 : vector<256x128xf32> to vector<256x128xbf16>
    %c0_17 = arith.constant 0 : index
    %c0_18 = arith.constant 0 : index
    %23 = vector.load %arg8[%c0_17, %c0_18] : memref<256x128xbf16, #tpu.memory_space<vmem>>, vector<256x128xbf16>
    tpu.vector_store %arg8[%c0_17, %c0_18], %22 {strides = array<i32>} : memref<256x128xbf16, #tpu.memory_space<vmem>>, vector<256x128xbf16>,
    return
  }
  func.func @transform_0(%arg0: i32) -> (i32, i32) {
    %c0_i32 = arith.constant 0 : i32
    %c0_i32_0 = arith.constant 0 : i32
    return %arg0, %c0_i32 : i32, i32
  }
  func.func @transform_1(%arg0: i32) -> (i32, i32) {
    %c0_i32 = arith.constant 0 : i32
    %c0_i32_0 = arith.constant 0 : i32
    %c0_i32_1 = arith.constant 0 : i32
    return %c0_i32, %c0_i32_0 : i32, i32
  }
  func.func @transform_2(%arg0: i32) -> (i32, i32) {
    %c0_i32 = arith.constant 0 : i32
    %c0_i32_0 = arith.constant 0 : i32
    %c0_i32_1 = arith.constant 0 : i32
    return %c0_i32, %c0_i32_0 : i32, i32
  }
  func.func @transform_3(%arg0: i32) -> (i32, i32) {
    %c0_i32 = arith.constant 0 : i32
    %c0_i32_0 = arith.constant 0 : i32
    %c0_i32_1 = arith.constant 0 : i32
    return %c0_i32, %c0_i32_0 : i32, i32
  }
  func.func @transform_4(%arg0: i32) -> (i32, i32) {
    %c0_i32 = arith.constant 0 : i32
    %c0_i32_0 = arith.constant 0 : i32
    %c0_i32_1 = arith.constant 0 : i32
    return %c0_i32, %c0_i32_0 : i32, i32
  }
  func.func @transform_5(%arg0: i32) -> (i32, i32) {
    %c0_i32 = arith.constant 0 : i32
    %c0_i32_0 = arith.constant 0 : i32
    %c0_i32_1 = arith.constant 0 : i32
    return %c0_i32, %c0_i32_0 : i32, i32
  }
  func.func @transform_6(%arg0: i32) -> (i32, i32) {
    %c0_i32 = arith.constant 0 : i32
    %c0_i32_0 = arith.constant 0 : i32
    %c0_i32_1 = arith.constant 0 : i32
    return %c0_i32, %c0_i32_0 : i32, i32
  }
  func.func @transform_7(%arg0: i32) -> (i32, i32) {
    %c0_i32 = arith.constant 0 : i32
    %c0_i32_0 = arith.constant 0 : i32
    return %arg0, %c0_i32 : i32, i32
  }
}

</mosaic_0001>

<bundles_post_ra>
// kernel: tpu_custom_call.1
= control target key start
LH: loop header
LB: loop body
LE: loop exit
PB: predicated region body
PF: predicated region fallthrough
CT: control target
= control target key end

     0   :  { %s5482_s0 = inlined_call_operand.vmem [shape: bf16[256,784], index: 0, kind: input, shape index: {}]   ;;  %s5483_s1 = inlined_call_operand.vmem [shape: bf16[784,256], index: 1, kind: input, shape index: {}]   ;;  %s5484_s2 = inlined_call_operand.vmem [shape: f32[1,256], index: 2, kind: input, shape index: {}]   ;;  %s5485_s3 = inlined_call_operand.vmem [shape: bf16[256,128], index: 3, kind: input, shape index: {}]   ;;  %s5486_s4 = inlined_call_operand.vmem [shape: f32[1,128], index: 4, kind: input, shape index: {}]   ;;  %s5487_s5 = inlined_call_operand.vmem [shape: bf16[128,128], index: 5, kind: input, shape index: {}]   ;;  %s5488_s6 = inlined_call_operand.vmem [shape: f32[1,128], index: 6, kind: input, shape index: {}]   ;;  %s5489_s7 = inlined_call_operand.hbm [shape: bf16[256,128], index: 7, kind: output, shape index: {}]  }
   0x1   :  { %v4274_v0 = vld [vmem:[%s5483_s1 + $0x104] ss:$8 sps:$4 sm:$0xff]   ;;  %v4279_v1 = vld [vmem:[%s5483_s1 + $0x100] ss:$8 sps:$4 sm:$0xff]   ;;  %v4285_v2 = vld [vmem:[%s5483_s1 + $0x114] ss:$8 sps:$4 sm:$0xff]  }
   0x2   :  { %1558 = vmatprep.subr.bf16.mxu0 %v4274_v0  ;;  %v4291_v3 = vld [vmem:[%s5483_s1 + $0x110] ss:$8 sps:$4 sm:$0xff]   ;;  %v4297_v4 = vld [vmem:[%s5483_s1 + $0x124] ss:$8 sps:$4 sm:$0xff]   ;;  %v4303_v5 = vld [vmem:[%s5483_s1 + $0x120] ss:$8 sps:$4 sm:$0xff]  }
   0x3   :  { %1559 = vmatpush1.bf16.msra.mxu0 %v4279_v1  ;;  %v4309_v6 = vld [vmem:[%s5483_s1 + $0x134] ss:$8 sps:$4 sm:$0xff]   ;;  %v4315_v7 = vld [vmem:[%s5483_s1 + $0x130] ss:$8 sps:$4 sm:$0xff]   ;;  %v4321_v8 = vld [vmem:[%s5483_s1 + $0x144] ss:$8 sps:$4 sm:$0xff]  }
   0x4   :  { %1560 = vmatprep.subr.bf16.mxu0 %v4285_v2  ;;  %v4327_v9 = vld [vmem:[%s5483_s1 + $0x140] ss:$8 sps:$4 sm:$0xff]   ;;  %v4333_v10 = vld [vmem:[%s5483_s1 + $0x154] ss:$8 sps:$4 sm:$0xff]   ;;  %v4339_v11 = vld [vmem:[%s5483_s1 + $0x150] ss:$8 sps:$4 sm:$0xff]  }
   0x5   :  { %v4345_v12 = vld [vmem:[%s5483_s1 + $0x164] ss:$8 sps:$4 sm:$0xff]   ;;  %v4354_v14 = vld [vmem:[%s5483_s1 + $0x160] ss:$8 sps:$4 sm:$0xff]   ;;  %v4360_v15 = vld [vmem:[%s5483_s1 + $0x174] ss:$8 sps:$4 sm:$0xff]  }
   0x6   :  { %v3922_v13 = vld [vmem:[%s5482_s0 + $0xc] ss:$28 sps:$4 sm:$0xff]   ;;  %v4366_v16 = vld [vmem:[%s5483_s1 + $0x170] ss:$8 sps:$4 sm:$0xff]   ;;  %v4384_v19 = vld [vmem:[%s5483_s1 + $0x194] ss:$8 sps:$4 sm:$0xff]  }
   0x7   :  { %1561 = vmatpush1.bf16.msra.mxu0 %v4291_v3  ;;  %1590 = vmatprep.mubr.bf16.mxu0 %v3922_v13  ;;  %v4372_v17 = vld [vmem:[%s5483_s1 + $0x184] ss:$8 sps:$4 sm:$0xff]   ;;  %v4378_v18 = vld [vmem:[%s5483_s1 + $0x180] ss:$8 sps:$4 sm:$0xff]   ;;  %v4390_v20 = vld [vmem:[%s5483_s1 + $0x190] ss:$8 sps:$4 sm:$0xff]  }
   0x8   :  { %1562 = vmatprep.subr.bf16.mxu0 %v4297_v4  ;;  %v4396_v21 = vld [vmem:[%s5483_s1 + $0x1a4] ss:$8 sps:$4 sm:$0xff]   ;;  %v4402_v22 = vld [vmem:[%s5483_s1 + $0x1a0] ss:$8 sps:$4 sm:$0xff]   ;;  %v4408_v23 = vld [vmem:[%s5483_s1 + $0x1b4] ss:$8 sps:$4 sm:$0xff]  }
   0x9   :  { %v4414_v24 = vld [vmem:[%s5483_s1 + $0x1b0] ss:$8 sps:$4 sm:$0xff]   ;;  %v4420_v25 = vld [vmem:[%s5483_s1 + $0x1c4] ss:$8 sps:$4 sm:$0xff]   ;;  %v4426_v26 = vld [vmem:[%s5483_s1 + $0x1c0] ss:$8 sps:$4 sm:$0xff]  }
   0xa   :  { %v4432_v27 = vld [vmem:[%s5483_s1 + $0x1d4] ss:$8 sps:$4 sm:$0xff]   ;;  %v4438_v28 = vld [vmem:[%s5483_s1 + $0x1d0] ss:$8 sps:$4 sm:$0xff]   ;;  %v4444_v29 = vld [vmem:[%s5483_s1 + $0x1e4] ss:$8 sps:$4 sm:$0xff]  }
   0xb   :  { %1563 = vmatpush1.bf16.msra.mxu0 %v4303_v5  ;;  %v4450_v30 = vld [vmem:[%s5483_s1 + $0x1e0] ss:$8 sps:$4 sm:$0xff]   ;;  %v4456_v31 = vld [vmem:[%s5483_s1 + $0x1f4] ss:$8 sps:$4 sm:$0xff]   ;;  %v4461_v32 = vld [vmem:[%s5483_s1 + $0x1f0] ss:$8 sps:$4 sm:$0xff]  }
   0xc   :  { %1564 = vmatprep.subr.bf16.mxu0 %v4309_v6  ;;  %v4004_v33 = vld [vmem:[%s5483_s1 + $0x4] ss:$8 sps:$4 sm:$0xff]   ;;  %v4006_v34 = vld [vmem:[%s5483_s1] ss:$8 sps:$4 sm:$0xff]   ;;  %v4010_v38 = vld [vmem:[%s5483_s1 + $0x14] ss:$8 sps:$4 sm:$0xff]  }
   0xd   :  { %v3920_v35 = vld [vmem:[%s5482_s0 + $0x8] ss:$28 sps:$4 sm:$0xff]   ;;  %1365 = vmatprep.subr.bf16.mxu1 %v4004_v33  ;;  %v3928_v39 = vld [vmem:[%s5483_s1 + $0x214] ss:$8 sps:$4 sm:$0xff]   ;;  %v4015_v41 = vld [vmem:[%s5483_s1 + $0x10] ss:$8 sps:$4 sm:$0xff]  }
   0xe   :  { %v3925_v36 = vld [vmem:[%s5483_s1 + $0x204] ss:$8 sps:$4 sm:$0xff]   ;;  %v3923_v37 = vld [vmem:[%s5483_s1 + $0x200] ss:$8 sps:$4 sm:$0xff]   ;;  %1366 = vmatpush1.bf16.msra.mxu1 %v4006_v34  ;;  %v3926_v44 = vld [vmem:[%s5483_s1 + $0x210] ss:$8 sps:$4 sm:$0xff]  }
   0xf   :  { %1565 = vmatpush1.bf16.msra.mxu0 %v4315_v7  ;;  %v3929_v40 = vld [vmem:[%s5482_s0 + $0x44] ss:$28 sps:$4 sm:$0xff]   ;;  %1367 = vmatprep.subr.bf16.mxu1 %v4010_v38  ;;  %v4021_v45 = vld [vmem:[%s5483_s1 + $0x34] ss:$8 sps:$4 sm:$0xff]   ;;  %v4024_v48 = vld [vmem:[%s5483_s1 + $0x30] ss:$8 sps:$4 sm:$0xff]  }
  0x10   :  { %1566 = vmatprep.subr.bf16.mxu0 %v4321_v8  ;;  %v4016_v42 = vld [vmem:[%s5483_s1 + $0x24] ss:$8 sps:$4 sm:$0xff]   ;;  %v4018_v43 = vld [vmem:[%s5483_s1 + $0x20] ss:$8 sps:$4 sm:$0xff]   ;;  %v3935_v50 = vld [vmem:[%s5482_s0 + $0x7c] ss:$28 sps:$4 sm:$0xff]  }
  0x11   :  { %v3934_v46 = vld [vmem:[%s5483_s1 + $0x224] ss:$8 sps:$4 sm:$0xff]   ;;  %v3931_v47 = vld [vmem:[%s5482_s0 + $0x40] ss:$28 sps:$4 sm:$0xff]   ;;  %v3938_v54 = vld [vmem:[%s5483_s1 + $0x230] ss:$8 sps:$4 sm:$0xff]  }
  0x12   :  { %1368 = vmatpush1.bf16.msra.mxu1 %v4015_v41  ;;  %v3932_v49 = vld [vmem:[%s5483_s1 + $0x220] ss:$8 sps:$4 sm:$0xff]   ;;  %v3940_v51 = vld [vmem:[%s5483_s1 + $0x234] ss:$8 sps:$4 sm:$0xff]   ;;  %v4025_v52 = vld [vmem:[%s5483_s1 + $0x44] ss:$8 sps:$4 sm:$0xff]  }
  0x13   :  { %1567 = vmatpush1.bf16.msra.mxu0 %v4327_v9  ;;  %1369 = vmatprep.subr.bf16.mxu1 %v4016_v42  ;;  %v4027_v53 = vld [vmem:[%s5483_s1 + $0x40] ss:$8 sps:$4 sm:$0xff]   ;;  %v4030_v55 = vld [vmem:[%s5483_s1 + $0x54] ss:$8 sps:$4 sm:$0xff]   ;;  %v3946_v56 = vld [vmem:[%s5483_s1 + $0x244] ss:$8 sps:$4 sm:$0xff]  }
  0x14   :  { %1568 = vmatprep.subr.bf16.mxu0 %v4333_v10  ;;  %v3937_v57 = vld [vmem:[%s5482_s0 + $0x78] ss:$28 sps:$4 sm:$0xff]   ;;  %v3944_v60 = vld [vmem:[%s5483_s1 + $0x240] ss:$8 sps:$4 sm:$0xff]   ;;  %v4034_v62 = vld [vmem:[%s5483_s1 + $0x64] ss:$8 sps:$4 sm:$0xff]  }
  0x15   :  { %v4033_v58 = vld [vmem:[%s5483_s1 + $0x50] ss:$8 sps:$4 sm:$0xff]   ;;  %v3949_v61 = vld [vmem:[%s5483_s1 + $0x254] ss:$8 sps:$4 sm:$0xff]   ;;  %v4036_v63 = vld [vmem:[%s5483_s1 + $0x60] ss:$8 sps:$4 sm:$0xff]  }
  0x16   :  { %1370 = vmatpush1.bf16.msra.mxu1 %v4018_v43  ;;  %v3941_v59 = vld [vmem:[%s5482_s0 + $0xb4] ss:$28 sps:$4 sm:$0xff]   ;;  %v3955_v34 = vld [vmem:[%s5483_s1 + $0x264] ss:$8 sps:$4 sm:$0xff]   ;;  %v3953_v38 = vld [vmem:[%s5483_s1 + $0x260] ss:$8 sps:$4 sm:$0xff]  }
  0x17   :  { %1569 = vmatpush1.bf16.msra.mxu0 %v4339_v11  ;;  %1371 = vmatprep.subr.bf16.mxu1 %v4021_v45  ;;  %v3947_v13 = vld [vmem:[%s5483_s1 + $0x250] ss:$8 sps:$4 sm:$0xff]   ;;  %v4039_v33 = vld [vmem:[%s5483_s1 + $0x74] ss:$8 sps:$4 sm:$0xff]   ;;  %v4045_v41 = vld [vmem:[%s5483_s1 + $0x80] ss:$8 sps:$4 sm:$0xff]  }
  0x18   :  { %1570 = vmatprep.subr.bf16.mxu0 %v4345_v12  ;;  %v3959_v42 = vld [vmem:[%s5483_s1 + $0x270] ss:$8 sps:$4 sm:$0xff]   ;;  %v4048_v43 = vld [vmem:[%s5483_s1 + $0x94] ss:$8 sps:$4 sm:$0xff]   ;;  %v3967_v45 = vld [vmem:[%s5483_s1 + $0x284] ss:$8 sps:$4 sm:$0xff]  }
  0x1a   :  { %1372 = vmatpush1.bf16.msra.mxu1 %v4024_v48  ;;  %v4081_v48 = vld [vmem:[%s5482_s0 + $0x4] ss:$28 sps:$4 sm:$0xff]  }
  0x1b   :  { %1571 = vmatpush1.bf16.msra.mxu0 %v4354_v14  ;;  %1373 = vmatprep.subr.bf16.mxu1 %v4025_v52  ;;  %v3968_v52 = vld [vmem:[%s5483_s1 + $0x290] ss:$8 sps:$4 sm:$0xff]  }
  0x1c   :  { %1572 = vmatprep.subr.bf16.mxu0 %v4360_v15  ;;  %1397 = vmatprep.mubr.bf16.mxu1 %v4081_v48  ;;  %v4003_v48 = vld [vmem:[%s5483_s1 + $0x2f4] ss:$8 sps:$4 sm:$0xff]  }
  0x1e   :  { %1374 = vmatpush1.bf16.msra.mxu1 %v4027_v53  ;;  %v3976_v53 = vld [vmem:[%s5483_s1 + $0x2a4] ss:$8 sps:$4 sm:$0xff]  }
  0x1f   :  { %1573 = vmatpush1.bf16.msra.mxu0 %v4366_v16  ;;  %1375 = vmatprep.subr.bf16.mxu1 %v4030_v55  ;;  %v4057_v55 = vld [vmem:[%s5483_s1 + $0xb4] ss:$8 sps:$4 sm:$0xff]  }
  0x20   :  { %1574 = vmatprep.subr.bf16.mxu0 %v4372_v17 }
  0x22   :  { %1376 = vmatpush1.bf16.msra.mxu1 %v4033_v58  ;;  %v3962_v58 = vld [vmem:[%s5482_s0 + $0x15c] ss:$28 sps:$4 sm:$0xff]  }
  0x23   :  { %1575 = vmatpush1.bf16.msra.mxu0 %v4378_v18  ;;  %1377 = vmatprep.subr.bf16.mxu1 %v4034_v62  ;;  %v3980_v62 = vld [vmem:[%s5483_s1 + $0x2b0] ss:$8 sps:$4 sm:$0xff]  }
  0x24   :  { %1576 = vmatprep.subr.bf16.mxu0 %v4384_v19 }
  0x26   :  { %1378 = vmatpush1.bf16.msra.mxu1 %v4036_v63  ;;  %v3988_v63 = vld [vmem:[%s5483_s1 + $0x2c4] ss:$8 sps:$4 sm:$0xff]  }
  0x27   :  { %1577 = vmatpush1.bf16.msra.mxu0 %v4390_v20  ;;  %1379 = vmatprep.subr.bf16.mxu1 %v4039_v33  ;;  %v4066_v33 = vld [vmem:[%s5483_s1 + $0xd4] ss:$8 sps:$4 sm:$0xff]  }
  0x28   :  { %1578 = vmatprep.subr.bf16.mxu0 %v4396_v21 }
  0x2b   :  { %1579 = vmatpush1.bf16.msra.mxu0 %v4402_v22 }
  0x2c   :  { %1580 = vmatprep.subr.bf16.mxu0 %v4408_v23 }
  0x2f   :  { %1581 = vmatpush1.bf16.msra.mxu0 %v4414_v24 }
  0x30   :  { %1582 = vmatprep.subr.bf16.mxu0 %v4420_v25 }
  0x33   :  { %1583 = vmatpush1.bf16.msra.mxu0 %v4426_v26 }
  0x34   :  { %1584 = vmatprep.subr.bf16.mxu0 %v4432_v27 }
  0x37   :  { %1585 = vmatpush1.bf16.msra.mxu0 %v4438_v28 }
  0x38   :  { %1586 = vmatprep.subr.bf16.mxu0 %v4444_v29 }
  0x3b   :  { %1587 = vmatpush1.bf16.msra.mxu0 %v4450_v30 }
  0x3c   :  { %1588 = vmatprep.subr.bf16.mxu0 %v4456_v31 }
  0x3f   :  { %1589 = vmatpush1.bf16.msra.mxu0 %v4461_v32 }
  0x40   :  { %1751 = vmatprep.subr.bf16.mxu0 %v3925_v36  ;;  %v4042_v36 = vld [vmem:[%s5483_s1 + $0x70] ss:$8 sps:$4 sm:$0xff]  }
  0x41   :  { %1380 = vmatpush1.bf16.msra.mxu1 %v4042_v36  ;;  %v3971_v36 = vld [vmem:[%s5482_s0 + $0x194] ss:$28 sps:$4 sm:$0xff]  }
  0x42   :  { %1591 = vmatmul.mubr.bf16.vlgmr.msra.gmra.mrb[0].mxu0 %v3920_v35  ;;  %v3943_v35 = vld [vmem:[%s5482_s0 + $0xb0] ss:$28 sps:$4 sm:$0xff]  }
  0x43   :  { %1752 = vmatpush1.bf16.msra.mxu0 %v3923_v37  ;;  %1600 = vmatprep.mubr.bf16.mxu0 %v3929_v40  ;;  %v3950_v37 = vld [vmem:[%s5482_s0 + $0xec] ss:$28 sps:$4 sm:$0xff]  }
  0x44   :  { %1753 = vmatprep.subr.bf16.mxu0 %v3928_v39  ;;  %v3961_v39 = vld [vmem:[%s5483_s1 + $0x274] ss:$8 sps:$4 sm:$0xff]   ;;  %v4043_v40 = vld [vmem:[%s5483_s1 + $0x84] ss:$8 sps:$4 sm:$0xff]  }
  0x45   :  { %1381 = vmatprep.subr.bf16.mxu1 %v4043_v40  ;;  %v3989_v40 = vld [vmem:[%s5483_s1 + $0x2d0] ss:$8 sps:$4 sm:$0xff]  }
  0x46   :  { %1382 = vmatpush1.bf16.msra.mxu1 %v4045_v41  ;;  %v3997_v41 = vld [vmem:[%s5483_s1 + $0x2e4] ss:$8 sps:$4 sm:$0xff]  }
  0x47   :  { %1754 = vmatpush1.bf16.msra.mxu0 %v3926_v44  ;;  %v3952_v44 = vld [vmem:[%s5482_s0 + $0xe8] ss:$28 sps:$4 sm:$0xff]   ;;  %1383 = vmatprep.subr.bf16.mxu1 %v4048_v43  ;;  %v4075_v43 = vld [vmem:[%s5483_s1 + $0xf4] ss:$8 sps:$4 sm:$0xff]  }
  0x48   :  { %1755 = vmatprep.subr.bf16.mxu0 %v3934_v46  ;;  %v3956_v46 = vld [vmem:[%s5482_s0 + $0x124] ss:$28 sps:$4 sm:$0xff]  }
  0x4a   :  { %1601 = vmatmul.mubr.bf16.gmra.mrb[4].mxu0 %v3931_v47  ;;  %v3965_v47 = vld [vmem:[%s5483_s1 + $0x280] ss:$8 sps:$4 sm:$0xff]  }
  0x4b   :  { %1756 = vmatpush1.bf16.msra.mxu0 %v3932_v49  ;;  %1610 = vmatprep.mubr.bf16.mxu0 %v3935_v50  ;;  %v3970_v49 = vld [vmem:[%s5483_s1 + $0x294] ss:$8 sps:$4 sm:$0xff]   ;;  %v4051_v50 = vld [vmem:[%s5483_s1 + $0x90] ss:$8 sps:$4 sm:$0xff]  }
  0x4c   :  { %1757 = vmatprep.subr.bf16.mxu0 %v3940_v51  ;;  %v4052_v51 = vld [vmem:[%s5483_s1 + $0xa4] ss:$8 sps:$4 sm:$0xff]   ;;  %1384 = vmatpush1.bf16.msra.mxu1 %v4051_v50  ;;  %v4001_v50 = vld [vmem:[%s5483_s1 + $0x2f0] ss:$8 sps:$4 sm:$0xff]  }
  0x4d   :  { %1385 = vmatprep.subr.bf16.mxu1 %v4052_v51  ;;  %v4085_v51 = vld [vmem:[%s5482_s0 + $0x3c] ss:$28 sps:$4 sm:$0xff]  }
  0x4f   :  { %1758 = vmatpush1.bf16.msra.mxu0 %v3938_v54  ;;  %v4054_v54 = vld [vmem:[%s5483_s1 + $0xa0] ss:$8 sps:$4 sm:$0xff]  }
  0x50   :  { %1759 = vmatprep.subr.bf16.mxu0 %v3946_v56  ;;  %v3958_v56 = vld [vmem:[%s5482_s0 + $0x120] ss:$28 sps:$4 sm:$0xff]   ;;  %1386 = vmatpush1.bf16.msra.mxu1 %v4054_v54 }
  0x51   :  { %1387 = vmatprep.subr.bf16.mxu1 %v4057_v55  ;;  %v3983_v54 = vld [vmem:[%s5482_s0 + $0x204] ss:$28 sps:$4 sm:$0xff]   ;;  %v4087_v55 = vld [vmem:[%s5482_s0 + $0x38] ss:$28 sps:$4 sm:$0xff]  }
  0x52   :  { %1611 = vmatmul.mubr.bf16.gmra.mrb[8].mxu0 %v3937_v57  ;;  %v4060_v57 = vld [vmem:[%s5483_s1 + $0xb0] ss:$8 sps:$4 sm:$0xff]  }
  0x53   :  { %1620 = vmatprep.mubr.bf16.mxu0 %v3941_v59  ;;  %1760 = vmatpush1.bf16.msra.mxu0 %v3944_v60  ;;  %v3974_v59 = vld [vmem:[%s5483_s1 + $0x2a0] ss:$8 sps:$4 sm:$0xff]   ;;  %v3982_v60 = vld [vmem:[%s5483_s1 + $0x2b4] ss:$8 sps:$4 sm:$0xff]  }
  0x54   :  { %1761 = vmatprep.subr.bf16.mxu0 %v3949_v61  ;;  %v4061_v61 = vld [vmem:[%s5483_s1 + $0xc4] ss:$8 sps:$4 sm:$0xff]   ;;  %1388 = vmatpush1.bf16.msra.mxu1 %v4060_v57 }
  0x55   :  { %1389 = vmatprep.subr.bf16.mxu1 %v4061_v61 }
  0x57   :  { %1762 = vmatpush1.bf16.msra.mxu0 %v3947_v13  ;;  %v4063_v13 = vld [vmem:[%s5483_s1 + $0xc0] ss:$8 sps:$4 sm:$0xff]  }
  0x58   :  { %1763 = vmatprep.subr.bf16.mxu0 %v3955_v34  ;;  %v3964_v34 = vld [vmem:[%s5482_s0 + $0x158] ss:$28 sps:$4 sm:$0xff]   ;;  %1390 = vmatpush1.bf16.msra.mxu1 %v4063_v13 }
  0x59   :  { %1391 = vmatprep.subr.bf16.mxu1 %v4066_v33 }
  0x5a   :  { %1621 = vmatmul.mubr.bf16.gmra.mrb[12].mxu0 %v3943_v35  ;;  %v4069_v35 = vld [vmem:[%s5483_s1 + $0xd0] ss:$8 sps:$4 sm:$0xff]  }
  0x5b   :  { %1630 = vmatprep.mubr.bf16.mxu0 %v3950_v37  ;;  %1764 = vmatpush1.bf16.msra.mxu0 %v3953_v38  ;;  %v3986_v37 = vld [vmem:[%s5483_s1 + $0x2c0] ss:$8 sps:$4 sm:$0xff]   ;;  %v3991_v38 = vld [vmem:[%s5483_s1 + $0x2d4] ss:$8 sps:$4 sm:$0xff]  }
  0x5c   :  { %1765 = vmatprep.subr.bf16.mxu0 %v3961_v39  ;;  %v4070_v39 = vld [vmem:[%s5483_s1 + $0xe4] ss:$8 sps:$4 sm:$0xff]   ;;  %1392 = vmatpush1.bf16.msra.mxu1 %v4069_v35 }
  0x5d   :  { %1393 = vmatprep.subr.bf16.mxu1 %v4070_v39 }
  0x5f   :  { %1766 = vmatpush1.bf16.msra.mxu0 %v3959_v42  ;;  %v4072_v42 = vld [vmem:[%s5483_s1 + $0xe0] ss:$8 sps:$4 sm:$0xff]  }
  0x60   :  { %1767 = vmatprep.subr.bf16.mxu0 %v3967_v45  ;;  %v4078_v45 = vld [vmem:[%s5483_s1 + $0xf0] ss:$8 sps:$4 sm:$0xff]   ;;  %1394 = vmatpush1.bf16.msra.mxu1 %v4072_v42 }
  0x61   :  { %1395 = vmatprep.subr.bf16.mxu1 %v4075_v43 }
  0x62   :  { %1631 = vmatmul.mubr.bf16.gmra.mrb[16].mxu0 %v3952_v44  ;;  %v3973_v44 = vld [vmem:[%s5482_s0 + $0x190] ss:$28 sps:$4 sm:$0xff]  }
  0x63   :  { %1640 = vmatprep.mubr.bf16.mxu0 %v3956_v46  ;;  %1768 = vmatpush1.bf16.msra.mxu0 %v3965_v47  ;;  %v3977_v46 = vld [vmem:[%s5482_s0 + $0x1cc] ss:$28 sps:$4 sm:$0xff]  }
  0x64   :  { %1769 = vmatprep.subr.bf16.mxu0 %v3970_v49  ;;  %v3995_v47 = vld [vmem:[%s5483_s1 + $0x2e0] ss:$8 sps:$4 sm:$0xff]   ;;  %1396 = vmatpush1.bf16.msra.mxu1 %v4078_v45 }
  0x65   :  { %v4079_v49 = vld [vmem:[%s5482_s0] ss:$28 sps:$4 sm:$0xff]   ;;  %3580 = vmatprep.subr.bf16.mxu1 %v4274_v0  ;;  %v4091_v0 = vld [vmem:[%s5482_s0 + $0x74] ss:$28 sps:$4 sm:$0xff]  }
  0x67   :  { %1770 = vmatpush1.bf16.msra.mxu0 %v3968_v52  ;;  %v4014_v52 = vld [vmem:[%s5483_s1 + $0x304] ss:$8 sps:$4 sm:$0xff]   ;;  %1398 = vmatmul.mubr.bf16.vlgmr.msra.gmra.mrb[0].mxu1 %v4079_v49 }
  0x68   :  { %1771 = vmatprep.subr.bf16.mxu0 %v3976_v53  ;;  %v3979_v53 = vld [vmem:[%s5482_s0 + $0x1c8] ss:$28 sps:$4 sm:$0xff]   ;;  %1407 = vmatprep.mubr.bf16.mxu1 %v4085_v51 }
  0x69   :  { %3596 = vmatpush1.bf16.msra.mxu1 %v4279_v1  ;;  %v3985_v1 = vld [vmem:[%s5482_s0 + $0x200] ss:$28 sps:$4 sm:$0xff]  }
  0x6a   :  { %1641 = vmatmul.mubr.bf16.gmra.mrb[20].mxu0 %v3958_v56  ;;  %3581 = vmatprep.subr.bf16.mxu1 %v4285_v2  ;;  %v3992_v56 = vld [vmem:[%s5482_s0 + $0x23c] ss:$28 sps:$4 sm:$0xff]   ;;  %v4093_v2 = vld [vmem:[%s5482_s0 + $0x70] ss:$28 sps:$4 sm:$0xff]  }
  0x6b   :  { %1650 = vmatprep.mubr.bf16.mxu0 %v3962_v58  ;;  %1772 = vmatpush1.bf16.msra.mxu0 %v3974_v59 }
  0x6c   :  { %1773 = vmatprep.subr.bf16.mxu0 %v3982_v60 }
  0x6d   :  { %3597 = vmatpush1.bf16.msra.mxu1 %v4291_v3  ;;  %v4097_v3 = vld [vmem:[%s5482_s0 + $0xac] ss:$28 sps:$4 sm:$0xff]  }
  0x6e   :  { %3582 = vmatprep.subr.bf16.mxu1 %v4297_v4  ;;  %v3994_v4 = vld [vmem:[%s5482_s0 + $0x238] ss:$28 sps:$4 sm:$0xff]  }
  0x6f   :  { %1774 = vmatpush1.bf16.msra.mxu0 %v3980_v62  ;;  %1408 = vmatmul.mubr.bf16.gmra.mrb[4].mxu1 %v4087_v55 }
  0x70   :  { %1775 = vmatprep.subr.bf16.mxu0 %v3988_v63  ;;  %1417 = vmatprep.mubr.bf16.mxu1 %v4091_v0 }
  0x71   :  { %3598 = vmatpush1.bf16.msra.mxu1 %v4303_v5  ;;  %v3998_v5 = vld [vmem:[%s5482_s0 + $0x274] ss:$28 sps:$4 sm:$0xff]  }
  0x72   :  { %1651 = vmatmul.mubr.bf16.gmra.mrb[24].mxu0 %v3964_v34  ;;  %3583 = vmatprep.subr.bf16.mxu1 %v4309_v6  ;;  %v4099_v6 = vld [vmem:[%s5482_s0 + $0xa8] ss:$28 sps:$4 sm:$0xff]  }
  0x73   :  { %1660 = vmatprep.mubr.bf16.mxu0 %v3971_v36  ;;  %1776 = vmatpush1.bf16.msra.mxu0 %v3986_v37 }
  0x74   :  { %1777 = vmatprep.subr.bf16.mxu0 %v3991_v38 }
  0x75   :  { %3599 = vmatpush1.bf16.msra.mxu1 %v4315_v7  ;;  %v4103_v7 = vld [vmem:[%s5482_s0 + $0xe4] ss:$28 sps:$4 sm:$0xff]  }
  0x76   :  { %3584 = vmatprep.subr.bf16.mxu1 %v4321_v8 }
  0x77   :  { %1778 = vmatpush1.bf16.msra.mxu0 %v3989_v40  ;;  %1418 = vmatmul.mubr.bf16.gmra.mrb[8].mxu1 %v4093_v2 }
  0x78   :  { %1779 = vmatprep.subr.bf16.mxu0 %v3997_v41  ;;  %1427 = vmatprep.mubr.bf16.mxu1 %v4097_v3 }
  0x79   :  { %3600 = vmatpush1.bf16.msra.mxu1 %v4327_v9 }
  0x7a   :  { %1661 = vmatmul.mubr.bf16.gmra.mrb[28].mxu0 %v3973_v44  ;;  %3585 = vmatprep.subr.bf16.mxu1 %v4333_v10 }
  0x7b   :  { %1670 = vmatprep.mubr.bf16.mxu0 %v3977_v46  ;;  %1780 = vmatpush1.bf16.msra.mxu0 %v3995_v47 }
  0x7c   :  { %1781 = vmatprep.subr.bf16.mxu0 %v4003_v48 }
  0x7d   :  { %3601 = vmatpush1.bf16.msra.mxu1 %v4339_v11 }
  0x7e   :  { %3586 = vmatprep.subr.bf16.mxu1 %v4345_v12 }
  0x7f   :  { %1782 = vmatpush1.bf16.msra.mxu0 %v4001_v50 }
  0x80   :  { %1944 = vmatprep.subr.bf16.mxu0 %v4014_v52 }
  0x82   :  { %1671 = vmatmul.mubr.bf16.gmra.mrb[32].mxu0 %v3979_v53 }
  0x83   :  { %1680 = vmatprep.mubr.bf16.mxu0 %v3983_v54 }
  0x8a   :  { %1681 = vmatmul.mubr.bf16.gmra.mrb[36].mxu0 %v3985_v1 }
  0x8b   :  { %1690 = vmatprep.mubr.bf16.mxu0 %v3992_v56 }
  0x92   :  { %1691 = vmatmul.mubr.bf16.gmra.mrb[40].mxu0 %v3994_v4 }
  0x93   :  { %1700 = vmatprep.mubr.bf16.mxu0 %v3998_v5 }
  0x94   :  { %12 = vsyncpa [#allocation3], 0  ;;  %1428 = vmatmul.mubr.bf16.gmra.mrb[12].mxu1 %v4099_v6  ;;  %v4000_v8 = vld [vmem:[%s5482_s0 + $0x270] ss:$28 sps:$4 sm:$0xff]   ;;  %v4105_v10 = vld [vmem:[%s5482_s0 + $0xe0] ss:$28 sps:$4 sm:$0xff]  }
  0x95   :  { %1437 = vmatprep.mubr.bf16.mxu1 %v4103_v7  ;;  %3602 = vmatpush1.bf16.msra.mxu1 %v4354_v14  ;;  %v4009_v9 = vld [vmem:[%s5482_s0 + $0x14] ss:$28 sps:$4 sm:$0xff]   ;;  %v4109_v11 = vld [vmem:[%s5482_s0 + $0x11c] ss:$28 sps:$4 sm:$0xff]   ;;  %v4012_v14 = vld [vmem:[%s5483_s1 + $0x300] ss:$8 sps:$4 sm:$0xff]  }
  0x96   :  { %3587 = vmatprep.subr.bf16.mxu1 %v4360_v15  ;;  %v4007_v12 = vld [vmem:[%s5482_s0 + $0x10] ss:$28 sps:$4 sm:$0xff]   ;;  %v4133_v57 = vld [vmem:[%s5482_s0 + $0x1f8] ss:$28 sps:$4 sm:$0xff]   ;;  %v4059_v58 = vld [vmem:[%s5482_s0 + $0x128] ss:$28 sps:$4 sm:$0xff]  }
  0x97   :  { %v4019_v15 = vld [vmem:[%s5482_s0 + $0x4c] ss:$28 sps:$4 sm:$0xff]   ;;  %v4064_v59 = vld [vmem:[%s5482_s0 + $0x164] ss:$28 sps:$4 sm:$0xff]   ;;  %v4073_v63 = vld [vmem:[%s5482_s0 + $0x19c] ss:$28 sps:$4 sm:$0xff]  }
  0x98   :  { %v4137_v60 = vld [vmem:[%s5482_s0 + $0x230] ss:$28 sps:$4 sm:$0xff]   ;;  %v4068_v62 = vld [vmem:[%s5482_s0 + $0x160] ss:$28 sps:$4 sm:$0xff]   ;;  %v4141_v13 = vld [vmem:[%s5482_s0 + $0x268] ss:$28 sps:$4 sm:$0xff]  }
  0x99   :  { %3603 = vmatpush1.bf16.msra.mxu1 %v4366_v16  ;;  %v4111_v16 = vld [vmem:[%s5482_s0 + $0x118] ss:$28 sps:$4 sm:$0xff]   ;;  %v4139_v61 = vld [vmem:[%s5482_s0 + $0x26c] ss:$28 sps:$4 sm:$0xff]   ;;  %v4143_v33 = vld [vmem:[%s5482_s0 + $0x2a4] ss:$28 sps:$4 sm:$0xff]  }
  0x9a   :  { %1701 = vmatmul.mubr.bf16.gmra.mrb[44].mxu0 %v4000_v8  ;;  %3588 = vmatprep.subr.bf16.mxu1 %v4372_v17  ;;  %v4115_v17 = vld [vmem:[%s5482_s0 + $0x154] ss:$28 sps:$4 sm:$0xff]   ;;  %v4145_v36 = vld [vmem:[%s5482_s0 + $0x2a0] ss:$28 sps:$4 sm:$0xff]   ;;  %v4088_v39 = vld [vmem:[%s5482_s0 + $0x20c] ss:$28 sps:$4 sm:$0xff]  }
  0x9b   :  { %1783 = vmatprep.mubr.bf16.mxu0 %v4009_v9  ;;  %v4077_v34 = vld [vmem:[%s5482_s0 + $0x198] ss:$28 sps:$4 sm:$0xff]   ;;  %v4084_v38 = vld [vmem:[%s5482_s0 + $0x1d0] ss:$28 sps:$4 sm:$0xff]   ;;  %v4090_v42 = vld [vmem:[%s5482_s0 + $0x208] ss:$28 sps:$4 sm:$0xff]  }
  0x9c   :  { %1438 = vmatmul.mubr.bf16.gmra.mrb[16].mxu1 %v4105_v10  ;;  %v4082_v35 = vld [vmem:[%s5482_s0 + $0x1d4] ss:$28 sps:$4 sm:$0xff]   ;;  %v4147_v37 = vld [vmem:[%s5482_s0 + $0x2dc] ss:$28 sps:$4 sm:$0xff]   ;;  %v4094_v43 = vld [vmem:[%s5482_s0 + $0x244] ss:$28 sps:$4 sm:$0xff]  }
  0x9d   :  { %1447 = vmatprep.mubr.bf16.mxu1 %v4109_v11  ;;  %3604 = vmatpush1.bf16.msra.mxu1 %v4378_v18  ;;  %v4023_v18 = vld [vmem:[%s5482_s0 + $0x48] ss:$28 sps:$4 sm:$0xff]   ;;  %v4149_v40 = vld [vmem:[%s5482_s0 + $0x2d8] ss:$28 sps:$4 sm:$0xff]   ;;  %v4153_v44 = vld [vmem:[%s5482_s0 + $0x310] ss:$28 sps:$4 sm:$0xff]  }
  0x9e   :  { %3589 = vmatprep.subr.bf16.mxu1 %v4384_v19  ;;  %v4028_v19 = vld [vmem:[%s5482_s0 + $0x84] ss:$28 sps:$4 sm:$0xff]   ;;  %v4151_v41 = vld [vmem:[%s5482_s0 + $0x314] ss:$28 sps:$4 sm:$0xff]   ;;  %v4155_v45 = vld [vmem:[%s5482_s0 + $0x34c] ss:$28 sps:$4 sm:$0xff]  }
  0x9f   :  { %v4096_v46 = vld [vmem:[%s5482_s0 + $0x240] ss:$28 sps:$4 sm:$0xff]   ;;  %v4157_v48 = vld [vmem:[%s5482_s0 + $0x348] ss:$28 sps:$4 sm:$0xff]   ;;  %v4102_v50 = vld [vmem:[%s5482_s0 + $0x278] ss:$28 sps:$4 sm:$0xff]  }
  0xa0   :  { %v4100_v47 = vld [vmem:[%s5482_s0 + $0x27c] ss:$28 sps:$4 sm:$0xff]   ;;  %v4161_v49 = vld [vmem:[%s5482_s0 + $0x2ac] ss:$28 sps:$4 sm:$0xff]   ;;  %v4106_v51 = vld [vmem:[%s5482_s0 + $0x2b4] ss:$28 sps:$4 sm:$0xff]  }
  0xa1   :  { %3605 = vmatpush1.bf16.msra.mxu1 %v4390_v20  ;;  %v4117_v20 = vld [vmem:[%s5482_s0 + $0x150] ss:$28 sps:$4 sm:$0xff]   ;;  %v4159_v52 = vld [vmem:[%s5482_s0 + $0x2a8] ss:$28 sps:$4 sm:$0xff]   ;;  %v4165_v0 = vld [vmem:[%s5482_s0 + $0x2e0] ss:$28 sps:$4 sm:$0xff]  }
  0xa2   :  { %1784 = vmatmul.mubr.bf16.vlgmr.msra.gmra.mrb[0].mxu0 %v4007_v12  ;;  %3590 = vmatprep.subr.bf16.mxu1 %v4396_v21  ;;  %v4121_v21 = vld [vmem:[%s5482_s0 + $0x18c] ss:$28 sps:$4 sm:$0xff]   ;;  %v4163_v53 = vld [vmem:[%s5482_s0 + $0x2e4] ss:$28 sps:$4 sm:$0xff]   ;;  %v4167_v1 = vld [vmem:[%s5482_s0 + $0x31c] ss:$28 sps:$4 sm:$0xff]  }
  0xa3   :  { %1945 = vmatpush1.bf16.msra.mxu0 %v4012_v14  ;;  %1793 = vmatprep.mubr.bf16.mxu0 %v4019_v15  ;;  %v4108_v54 = vld [vmem:[%s5482_s0 + $0x2b0] ss:$28 sps:$4 sm:$0xff]   ;;  %v4114_v56 = vld [vmem:[%s5482_s0 + $0x2e8] ss:$28 sps:$4 sm:$0xff]   ;;  %v4169_v3 = vld [vmem:[%s5482_s0 + $0x318] ss:$28 sps:$4 sm:$0xff]  }
  0xa4   :  { %1448 = vmatmul.mubr.bf16.gmra.mrb[20].mxu1 %v4111_v16  ;;  %v4112_v55 = vld [vmem:[%s5482_s0 + $0x2ec] ss:$28 sps:$4 sm:$0xff]   ;;  %v4118_v2 = vld [vmem:[%s5482_s0 + $0x324] ss:$28 sps:$4 sm:$0xff]   ;;  %v4171_v4 = vld [vmem:[%s5482_s0 + $0x354] ss:$28 sps:$4 sm:$0xff]  }
  0xa5   :  { %1457 = vmatprep.mubr.bf16.mxu1 %v4115_v17  ;;  %3606 = vmatpush1.bf16.msra.mxu1 %v4402_v22  ;;  %v4032_v22 = vld [vmem:[%s5482_s0 + $0x80] ss:$28 sps:$4 sm:$0xff]   ;;  %v4173_v7 = vld [vmem:[%s5482_s0 + $0x350] ss:$28 sps:$4 sm:$0xff]   ;;  %v4126_v8 = vld [vmem:[%s5482_s0 + $0x358] ss:$28 sps:$4 sm:$0xff]  }
  0xa6   :  { %3591 = vmatprep.subr.bf16.mxu1 %v4408_v23  ;;  %v4037_v23 = vld [vmem:[%s5482_s0 + $0xbc] ss:$28 sps:$4 sm:$0xff]   ;;  %v4179_v9 = vld [vmem:[%s5485_s3 + $0x40] sm:$0xff]   ;;  %v4227_v11 = vmov 0   ;;  %v4181_v12 = vld [vmem:[%s5485_s3 + $0x48] sm:$0xff]   ;;  %vm1316_vm0 = vcmask 130048  }
  0xa7   :  { %v4120_v5 = vld [vmem:[%s5482_s0 + $0x320] ss:$28 sps:$4 sm:$0xff]   ;;  %v4182_v14 = vld [vmem:[%s5485_s3 + $0x8] sm:$0xff]   ;;  %v4130_v15 = vld [vmem:[%s5482_s0 + $0x18] ss:$28 sps:$4 sm:$0xff]  }
  0xa8   :  { %v4124_v6 = vld [vmem:[%s5482_s0 + $0x35c] ss:$28 sps:$4 sm:$0xff]   ;;  %v4180_v10 = vld [vmem:[%s5485_s3] sm:$0xff]   ;;  %v4183_v16 = vld [vmem:[%s5485_s3 + $0x50] sm:$0xff]  }
  0xa9   :  { %3607 = vmatpush1.bf16.msra.mxu1 %v4414_v24  ;;  %v4123_v24 = vld [vmem:[%s5482_s0 + $0x188] ss:$28 sps:$4 sm:$0xff]   ;;  %v4184_v17 = vld [vmem:[%s5485_s3 + $0x10] sm:$0xff]  }
  0xaa   :  { %1794 = vmatmul.mubr.bf16.gmra.mrb[4].mxu0 %v4023_v18  ;;  %3592 = vmatprep.subr.bf16.mxu1 %v4420_v25  ;;  %v4127_v25 = vld [vmem:[%s5482_s0 + $0x1c4] ss:$28 sps:$4 sm:$0xff]   ;;  %v4185_v18 = vld [vmem:[%s5485_s3 + $0x58] sm:$0xff]  }
  0xab   :  { %1803 = vmatprep.mubr.bf16.mxu0 %v4028_v19  ;;  %v4186_v19 = vld [vmem:[%s5485_s3 + $0x18] sm:$0xff]  }
  0xac   :  { %1458 = vmatmul.mubr.bf16.gmra.mrb[24].mxu1 %v4117_v20  ;;  %v4134_v20 = vld [vmem:[%s5482_s0 + $0x50] ss:$28 sps:$4 sm:$0xff]  }
  0xad   :  { %1467 = vmatprep.mubr.bf16.mxu1 %v4121_v21  ;;  %3608 = vmatpush1.bf16.msra.mxu1 %v4426_v26  ;;  %v4041_v26 = vld [vmem:[%s5482_s0 + $0xb8] ss:$28 sps:$4 sm:$0xff]   ;;  %v4187_v21 = vld [vmem:[%s5485_s3 + $0x60] sm:$0xff]  }
  0xae   :  { %3593 = vmatprep.subr.bf16.mxu1 %v4432_v27  ;;  %v4046_v27 = vld [vmem:[%s5482_s0 + $0xf4] ss:$28 sps:$4 sm:$0xff]  }
  0xb1   :  { %3609 = vmatpush1.bf16.msra.mxu1 %v4438_v28  ;;  %v4129_v28 = vld [vmem:[%s5482_s0 + $0x1c0] ss:$28 sps:$4 sm:$0xff]  }
  0xb2   :  { %1804 = vmatmul.mubr.bf16.gmra.mrb[8].mxu0 %v4032_v22  ;;  %3594 = vmatprep.subr.bf16.mxu1 %v4444_v29  ;;  %v4131_v29 = vld [vmem:[%s5482_s0 + $0x1fc] ss:$28 sps:$4 sm:$0xff]   ;;  %v4188_v22 = vld [vmem:[%s5485_s3 + $0x20] sm:$0xff]  }
  0xb3   :  { %1813 = vmatprep.mubr.bf16.mxu0 %v4037_v23  ;;  %v4189_v23 = vld [vmem:[%s5485_s3 + $0x68] sm:$0xff]  }
  0xb4   :  { %1468 = vmatmul.mubr.bf16.gmra.mrb[28].mxu1 %v4123_v24  ;;  %v4138_v24 = vld [vmem:[%s5482_s0 + $0x88] ss:$28 sps:$4 sm:$0xff]  }
  0xb5   :  { %1477 = vmatprep.mubr.bf16.mxu1 %v4127_v25  ;;  %3610 = vmatpush1.bf16.msra.mxu1 %v4450_v30  ;;  %v4050_v30 = vld [vmem:[%s5482_s0 + $0xf0] ss:$28 sps:$4 sm:$0xff]   ;;  %v4142_v25 = vld [vmem:[%s5482_s0 + $0xc0] ss:$28 sps:$4 sm:$0xff]  }
  0xb6   :  { %3595 = vmatprep.subr.bf16.mxu1 %v4456_v31  ;;  %v4055_v31 = vld [vmem:[%s5482_s0 + $0x12c] ss:$28 sps:$4 sm:$0xff]  }
  0xb9   :  { %3611 = vmatpush1.bf16.msra.mxu1 %v4461_v32  ;;  %v4135_v32 = vld [vmem:[%s5482_s0 + $0x234] ss:$28 sps:$4 sm:$0xff]  }
  0xba   :  { %1814 = vmatmul.mubr.bf16.gmra.mrb[12].mxu0 %v4041_v26  ;;  %3396 = vmatprep.subr.bf16.mxu1 %v4179_v9  ;;  %v4146_v26 = vld [vmem:[%s5482_s0 + $0xf8] ss:$28 sps:$4 sm:$0xff]  }
  0xbb   :  { %1823 = vmatprep.mubr.bf16.mxu0 %v4046_v27  ;;  %v4150_v27 = vld [vmem:[%s5482_s0 + $0x130] ss:$28 sps:$4 sm:$0xff]  }
  0xbc   :  { %1478 = vmatmul.mubr.bf16.gmra.mrb[32].mxu1 %v4129_v28  ;;  %v4154_v28 = vld [vmem:[%s5482_s0 + $0x168] ss:$28 sps:$4 sm:$0xff]  }
  0xbd   :  { %1487 = vmatprep.mubr.bf16.mxu1 %v4131_v29 }
  0xc2   :  { %1824 = vmatmul.mubr.bf16.gmra.mrb[16].mxu0 %v4050_v30 }
  0xc3   :  { %1833 = vmatprep.mubr.bf16.mxu0 %v4055_v31 }
  0xc4   :  { %1488 = vmatmul.mubr.bf16.gmra.mrb[36].mxu1 %v4133_v57 }
  0xc5   :  { %1497 = vmatprep.mubr.bf16.mxu1 %v4135_v32  ;;  %v4158_v32 = vld [vmem:[%s5482_s0 + $0x1a0] ss:$28 sps:$4 sm:$0xff]  }
  0xca   :  { %1834 = vmatmul.mubr.bf16.gmra.mrb[20].mxu0 %v4059_v58 }
  0xcb   :  { %1843 = vmatprep.mubr.bf16.mxu0 %v4064_v59 }
  0xcc   :  { %1498 = vmatmul.mubr.bf16.gmra.mrb[40].mxu1 %v4137_v60 }
  0xcd   :  { %1507 = vmatprep.mubr.bf16.mxu1 %v4139_v61 }
  0xd2   :  { %1844 = vmatmul.mubr.bf16.gmra.mrb[24].mxu0 %v4068_v62  ;;  %v4162_v62 = vld [vmem:[%s5482_s0 + $0x1d8] ss:$28 sps:$4 sm:$0xff]  }
  0xd3   :  { %1853 = vmatprep.mubr.bf16.mxu0 %v4073_v63 }
  0xd4   :  { %1508 = vmatmul.mubr.bf16.gmra.mrb[44].mxu1 %v4141_v13 }
  0xd5   :  { %1517 = vmatprep.mubr.bf16.mxu1 %v4143_v33 }
  0xda   :  { %1854 = vmatmul.mubr.bf16.gmra.mrb[28].mxu0 %v4077_v34 }
  0xdb   :  { %1863 = vmatprep.mubr.bf16.mxu0 %v4082_v35  ;;  %v4166_v35 = vld [vmem:[%s5482_s0 + $0x210] ss:$28 sps:$4 sm:$0xff]  }
  0xdc   :  { %1518 = vmatmul.mubr.bf16.gmra.mrb[48].mxu1 %v4145_v36 }
  0xdd   :  { %1527 = vmatprep.mubr.bf16.mxu1 %v4147_v37 }
  0xe2   :  { %1864 = vmatmul.mubr.bf16.gmra.mrb[32].mxu0 %v4084_v38 }
  0xe3   :  { %1873 = vmatprep.mubr.bf16.mxu0 %v4088_v39 }
  0xe4   :  { %1528 = vmatmul.mubr.bf16.gmra.mrb[52].mxu1 %v4149_v40  ;;  %v4170_v40 = vld [vmem:[%s5482_s0 + $0x248] ss:$28 sps:$4 sm:$0xff]  }
  0xe5   :  { %1537 = vmatprep.mubr.bf16.mxu1 %v4151_v41 }
  0xea   :  { %1874 = vmatmul.mubr.bf16.gmra.mrb[36].mxu0 %v4090_v42 }
  0xeb   :  { %1883 = vmatprep.mubr.bf16.mxu0 %v4094_v43 }
  0xec   :  { %1538 = vmatmul.mubr.bf16.gmra.mrb[56].mxu1 %v4153_v44 }
  0xed   :  { %1547 = vmatprep.mubr.bf16.mxu1 %v4155_v45  ;;  %v4190_v45 = vld [vmem:[%s5485_s3 + $0x28] sm:$0xff]  }
  0xf2   :  { %1884 = vmatmul.mubr.bf16.gmra.mrb[40].mxu0 %v4096_v46  ;;  %v4174_v46 = vld [vmem:[%s5482_s0 + $0x280] ss:$28 sps:$4 sm:$0xff]  }
  0xf3   :  { %1893 = vmatprep.mubr.bf16.mxu0 %v4100_v47  ;;  %v4191_v47 = vld [vmem:[%s5485_s3 + $0x70] sm:$0xff]  }
  0xf4   :  { %1548 = vmatmul.mubr.bf16.gmra.mrb[60].mxu1 %v4157_v48  ;;  %v4192_v48 = vld [vmem:[%s5485_s3 + $0x30] sm:$0xff]  }
  0xf5   :  { %1710 = vmatprep.mubr.bf16.mxu1 %v4161_v49 }
  0xfa   :  { %1894 = vmatmul.mubr.bf16.gmra.mrb[44].mxu0 %v4102_v50 }
  0xfb   :  { %1903 = vmatprep.mubr.bf16.mxu0 %v4106_v51 }
  0xfc   :  { %1711 = vmatmul.mubr.bf16.vlgmr.msra.gmra.mrb[48].mxu1 %v4159_v52  ;;  %v4193_v52 = vld [vmem:[%s5485_s3 + $0x78] sm:$0xff]  }
  0xfd   :  { %1720 = vmatprep.mubr.bf16.mxu1 %v4163_v53  ;;  %3397 = vmatpush3.bf16.msra.mxu1 %v4180_v10 }
  0xfe   :  { %3398 = vmatprep.subr.bf16.mxu1 %v4181_v12 }
 0x101   :  { %3399 = vmatpush3.bf16.msra.mxu1 %v4182_v14 }
 0x102   :  { %1904 = vmatmul.mubr.bf16.gmra.mrb[48].mxu0 %v4108_v54  ;;  %3400 = vmatprep.subr.bf16.mxu1 %v4183_v16  ;;  %v4194_v54 = vld [vmem:[%s5485_s3 + $0x38] sm:$0xff]  }
 0x103   :  { %1913 = vmatprep.mubr.bf16.mxu0 %v4112_v55  ;;  %v4175_v55 = vld [vmem:[%s5482_s0 + $0x2b8] ss:$28 sps:$4 sm:$0xff]  }
 0x104   :  { %1721 = vmatmul.mubr.bf16.gmra.mrb[52].mxu1 %v4165_v0 }
 0x105   :  { %1730 = vmatprep.mubr.bf16.mxu1 %v4167_v1  ;;  %3401 = vmatpush3.bf16.msra.mxu1 %v4184_v17 }
 0x106   :  { %3402 = vmatprep.subr.bf16.mxu1 %v4185_v18 }
 0x109   :  { %3403 = vmatpush3.bf16.msra.mxu1 %v4186_v19 }
 0x10a   :  { %1914 = vmatmul.mubr.bf16.gmra.mrb[52].mxu0 %v4114_v56  ;;  %3404 = vmatprep.subr.bf16.mxu1 %v4187_v21 }
 0x10b   :  { %1923 = vmatprep.mubr.bf16.mxu0 %v4118_v2 }
 0x10c   :  { %1731 = vmatmul.mubr.bf16.gmra.mrb[56].mxu1 %v4169_v3  ;;  %v4176_v3 = vld [vmem:[%s5482_s0 + $0x2f0] ss:$28 sps:$4 sm:$0xff]  }
 0x10d   :  { %1740 = vmatprep.mubr.bf16.mxu1 %v4171_v4  ;;  %3405 = vmatpush3.bf16.msra.mxu1 %v4188_v22 }
 0x10e   :  { %3406 = vmatprep.subr.bf16.mxu1 %v4189_v23 }
 0x111   :  { %3407 = vmatpush3.bf16.msra.mxu1 %v4190_v45 }
 0x112   :  { %1924 = vmatmul.mubr.bf16.gmra.mrb[56].mxu0 %v4120_v5  ;;  %3408 = vmatprep.subr.bf16.mxu1 %v4191_v47 }
 0x113   :  { %1933 = vmatprep.mubr.bf16.mxu0 %v4124_v6 }
 0x114   :  { %1741 = vmatmul.mubr.bf16.gmra.mrb[60].mxu1 %v4173_v7 }
 0x115   :  { %3409 = vmatpush3.bf16.msra.mxu1 %v4192_v48 }
 0x116   :  { %3410 = vmatprep.subr.bf16.mxu1 %v4193_v52 }
 0x119   :  { %3411 = vmatpush3.bf16.msra.mxu1 %v4194_v54 }
 0x11a   :  { %1934 = vmatmul.mubr.bf16.gmra.mrb[60].mxu0 %v4126_v8  ;;  %v4177_v8 = vld [vmem:[%s5482_s0 + $0x328] ss:$28 sps:$4 sm:$0xff]  }
 0x11b   :  { %1976 = vmatprep.mubr.bf16.mxu0 %v4227_v11 }
 0x122   :  { %3195 = vmatmul.mubr.msk.bf16.vlgmr.msra.gmra.mrb[0].mxu0 %vm1316_vm0, %v4130_v15  ;;  %v4178_v15 = vld [vmem:[%s5482_s0 + $0x360] ss:$28 sps:$4 sm:$0xff]  }
 0x123   :  { %1986 = vmatprep.mubr.bf16.mxu0 %v4227_v11 }
 0x12a   :  { %3196 = vmatmul.mubr.msk.bf16.gmra.mrb[4].mxu0 %vm1316_vm0, %v4134_v20 }
 0x12b   :  { %1996 = vmatprep.mubr.bf16.mxu0 %v4227_v11 }
 0x132   :  { %3197 = vmatmul.mubr.msk.bf16.gmra.mrb[8].mxu0 %vm1316_vm0, %v4138_v24 }
 0x133   :  { %2006 = vmatprep.mubr.bf16.mxu0 %v4227_v11 }
 0x13a   :  { %3198 = vmatmul.mubr.msk.bf16.gmra.mrb[12].mxu0 %vm1316_vm0, %v4142_v25  ;;  %v5048_v29 = vpop.f32.mrb[0].mxu1 }
 0x13b   :  { %2016 = vmatprep.mubr.bf16.mxu0 %v4227_v11  ;;  %v5050_v30 = vpop.f32.mrb[1].mxu1 }
 0x13c   :  { %v5053_v31 = vpop.f32.mrb[2].mxu1 }
 0x13d   :  { %v5056_v57 = vpop.f32.mrb[3].mxu1 }
 0x142   :  { %3199 = vmatmul.mubr.msk.bf16.gmra.mrb[16].mxu0 %vm1316_vm0, %v4146_v26  ;;  %v5061_v58 = vpop.f32.mrb[4].mxu1 }
 0x143   :  { %2026 = vmatprep.mubr.bf16.mxu0 %v4227_v11  ;;  %v5063_v59 = vpop.f32.mrb[5].mxu1 }
 0x144   :  { %v5066_v60 = vpop.f32.mrb[6].mxu1 }
 0x145   :  { %v5069_v61 = vpop.f32.mrb[7].mxu1 }
 0x14a   :  { %3200 = vmatmul.mubr.msk.bf16.gmra.mrb[20].mxu0 %vm1316_vm0, %v4150_v27  ;;  %v5074_v63 = vpop.f32.mrb[8].mxu1 }
 0x14b   :  { %2036 = vmatprep.mubr.bf16.mxu0 %v4227_v11  ;;  %v5076_v13 = vpop.f32.mrb[9].mxu1 }
 0x14c   :  { %v5079_v33 = vpop.f32.mrb[10].mxu1 }
 0x14d   :  { %v5082_v34 = vpop.f32.mrb[11].mxu1 }
 0x152   :  { %3201 = vmatmul.mubr.msk.bf16.gmra.mrb[24].mxu0 %vm1316_vm0, %v4154_v28 }
 0x153   :  { %2046 = vmatprep.mubr.bf16.mxu0 %v4227_v11 }
 0x15a   :  { %3202 = vmatmul.mubr.msk.bf16.gmra.mrb[28].mxu0 %vm1316_vm0, %v4158_v32 }
 0x15b   :  { %2056 = vmatprep.mubr.bf16.mxu0 %v4227_v11 }
 0x162   :  { %3203 = vmatmul.mubr.msk.bf16.gmra.mrb[32].mxu0 %vm1316_vm0, %v4162_v62 }
 0x163   :  { %2066 = vmatprep.mubr.bf16.mxu0 %v4227_v11 }
 0x167   :  { %v5087_v36 = vpop.f32.mrb[12].mxu1 }
 0x168   :  { %v5089_v37 = vpop.f32.mrb[13].mxu1 }
 0x169   :  { %v5092_v38 = vpop.f32.mrb[14].mxu1 }
 0x16a   :  { %3204 = vmatmul.mubr.msk.bf16.gmra.mrb[36].mxu0 %vm1316_vm0, %v4166_v35  ;;  %v5095_v39 = vpop.f32.mrb[15].mxu1 }
 0x16b   :  { %2076 = vmatprep.mubr.bf16.mxu0 %v4227_v11 }
 0x16f   :  { %v5100_v41 = vpop.f32.mrb[16].mxu1 }
 0x170   :  { %v5102_v42 = vpop.f32.mrb[17].mxu1 }
 0x171   :  { %v5105_v43 = vpop.f32.mrb[18].mxu1 }
 0x172   :  { %3205 = vmatmul.mubr.msk.bf16.gmra.mrb[40].mxu0 %vm1316_vm0, %v4170_v40  ;;  %v5108_v44 = vpop.f32.mrb[19].mxu1 }
 0x173   :  { %2086 = vmatprep.mubr.bf16.mxu0 %v4227_v11 }
 0x177   :  { %v5122_v49 = vpop.f32.mrb[20].mxu1 }
 0x178   :  { %v5124_v50 = vpop.f32.mrb[21].mxu1 }
 0x179   :  { %v5127_v51 = vpop.f32.mrb[22].mxu1 }
 0x17a   :  { %3206 = vmatmul.mubr.msk.bf16.gmra.mrb[44].mxu0 %vm1316_vm0, %v4174_v46  ;;  %v5133_v53 = vpop.f32.mrb[23].mxu1 }
 0x17b   :  { %2096 = vmatprep.mubr.bf16.mxu0 %v4227_v11 }
 0x17f   :  { %v5141_v0 = vpop.f32.mrb[24].mxu1 }
 0x180   :  { %v5143_v1 = vpop.f32.mrb[25].mxu1 }
 0x181   :  { %v5146_v56 = vpop.f32.mrb[26].mxu1 }
 0x182   :  { %3207 = vmatmul.mubr.msk.bf16.gmra.mrb[48].mxu0 %vm1316_vm0, %v4175_v55  ;;  %v5149_v2 = vpop.f32.mrb[27].mxu1  ;;  %v256_v55 = vlaneseq }
 0x183   :  { %2106 = vmatprep.mubr.bf16.mxu0 %v4227_v11 }
 0x187   :  { %v5154_v4 = vpop.f32.mrb[28].mxu1 }
 0x188   :  { %v5156_v5 = vpop.f32.mrb[29].mxu1 }
 0x189   :  { %v5159_v6 = vpop.f32.mrb[30].mxu1 }
 0x18a   :  { %3208 = vmatmul.mubr.msk.bf16.gmra.mrb[52].mxu0 %vm1316_vm0, %v4176_v3  ;;  %v5162_v7 = vpop.f32.mrb[31].mxu1  ;;  %v257_v3 = vshrl.u32 %v256_v55, 7 }
 0x18b   :  { %2116 = vmatprep.mubr.bf16.mxu0 %v4227_v11 }
 0x18f   :  { %v5167_v9 = vpop.f32.mrb[32].mxu1 }
 0x190   :  { %v5169_v10 = vpop.f32.mrb[33].mxu1 }
 0x191   :  { %v5172_v12 = vpop.f32.mrb[34].mxu1 }
 0x192   :  { %3209 = vmatmul.mubr.msk.bf16.gmra.mrb[56].mxu0 %vm1316_vm0, %v4177_v8  ;;  %v5175_v14 = vpop.f32.mrb[35].mxu1 }
 0x193   :  { %2126 = vmatprep.mubr.bf16.mxu0 %v4227_v11 }
 0x197   :  { %v5180_v16 = vpop.f32.mrb[36].mxu1 }
 0x198   :  { %v5182_v17 = vpop.f32.mrb[37].mxu1 }
 0x199   :  { %v5185_v18 = vpop.f32.mrb[38].mxu1 }
 0x19a   :  { %3210 = vmatmul.mubr.msk.bf16.gmra.mrb[60].mxu0 %vm1316_vm0, %v4178_v15  ;;  %v5187_v19 = vpop.f32.mrb[39].mxu1 }
 0x19f   :  { %v5189_v20 = vpop.f32.mrb[40].mxu1 }
 0x1a0   :  { %v5191_v21 = vpop.f32.mrb[41].mxu1 }
 0x1a1   :  { %v5193_v11 = vpop.f32.mrb[42].mxu1 }
 0x1a2   :  { %v5195_v22 = vpop.f32.mrb[43].mxu1 }
 0x1a7   :  { %v5197_v23 = vpop.f32.mrb[44].mxu1 }
 0x1a8   :  { %v5199_v24 = vpop.f32.mrb[45].mxu1 }
 0x1a9   :  { %v5201_v25 = vpop.f32.mrb[46].mxu1 }
 0x1aa   :  { %v5203_v26 = vpop.f32.mrb[47].mxu1 }
 0x1ab   :  { %5490 = vst [vmem:[#allocation5_spill] sm:$0xff] %v5203_v26 }
 0x1cf   :  { %v5205_v27 = vpop.f32.mrb[48].mxu1 }
 0x1d0   :  { %5491 = vst [vmem:[#allocation6_spill] sm:$0xff] %v5205_v27  ;;  %v5207_v28 = vpop.f32.mrb[49].mxu1 }
 0x1d1   :  { %5492 = vst [vmem:[#allocation7_spill] sm:$0xff] %v5207_v28  ;;  %v5209_v32 = vpop.f32.mrb[50].mxu1 }
 0x1d2   :  { %5493 = vst [vmem:[#allocation8_spill] sm:$0xff] %v5209_v32  ;;  %v5211_v62 = vpop.f32.mrb[51].mxu1 }
 0x1d3   :  { %5494 = vst [vmem:[#allocation9_spill] sm:$0xff] %v5211_v62 }
 0x1d7   :  { %v5213_v35 = vpop.f32.mrb[52].mxu1 }
 0x1d8   :  { %5495 = vst [vmem:[#allocation10_spill] sm:$0xff] %v5213_v35  ;;  %v5215_v40 = vpop.f32.mrb[53].mxu1 }
 0x1d9   :  { %5496 = vst [vmem:[#allocation11_spill] sm:$0xff] %v5215_v40  ;;  %v5217_v45 = vpop.f32.mrb[54].mxu1 }
 0x1da   :  { %5497 = vst [vmem:[#allocation12_spill] sm:$0xff] %v5217_v45  ;;  %v5219_v46 = vpop.f32.mrb[55].mxu1  ;;  %v258_v45 = vsub.s32 0, %v257_v3 }
 0x1db   :  { %5498 = vst [vmem:[#allocation13_spill] sm:$0xff] %v5219_v46 }
 0x1df   :  { %v5221_v47 = vpop.f32.mrb[56].mxu1 }
 0x1e0   :  { %5499 = vst [vmem:[#allocation14_spill] sm:$0xff] %v5221_v47  ;;  %v5223_v48 = vpop.f32.mrb[57].mxu1  ;;  %v254_v47 = vld [vmem:[%s5484_s2] sm:$0x3] }
 0x1e1   :  { %5500 = vst [vmem:[#allocation15_spill] sm:$0xff] %v5223_v48  ;;  %v5225_v52 = vpop.f32.mrb[58].mxu1  ;;  %v262_v48 = vsub.s32 1, %v257_v3  ;;  %v5240_v46 = vrot.slane %v254_v47, %v258_v45 }
 0x1e2   :  { %5501 = vst [vmem:[#allocation16_spill] sm:$0xff] %v5225_v52  ;;  %v5227_v54 = vpop.f32.mrb[59].mxu1 }
 0x1e3   :  { %5502 = vst [vmem:[#allocation17_spill] sm:$0xff] %v5227_v54  ;;  %v5242_v52 = vrot.slane %v254_v47, %v262_v48  ;;  %v1400_v55 = vadd.f32 %v5048_v29, %v5240_v46  ;;  %v4195_v29 = vld [vmem:[%s5487_s5] sm:$0xff]  }
 0x1e4   :  { %3532 = vmatprep.subr.bf16.mxu1 %v4195_v29 }
 0x1e5   :  { %v1406_v62 = vadd.f32 %v5056_v57, %v5242_v52  ;;  %v1412_v57 = vadd.f32 %v5063_v59, %v5242_v52 }
 0x1e7   :  { %v5229_v8 = vpop.f32.mrb[60].mxu1 }
 0x1e8   :  { %5503 = vst [vmem:[#allocation18_spill] sm:$0xff] %v5229_v8  ;;  %v5231_v15 = vpop.f32.mrb[61].mxu1 }
 0x1e9   :  { %5504 = vst [vmem:[#allocation19_spill] sm:$0xff] %v5231_v15  ;;  %v5233_v35 = vpop.f32.mrb[62].mxu1  ;;  %v1402_v15 = vadd.f32 %v5050_v30, %v5242_v52 }
 0x1ea   :  { %5505 = vst [vmem:[#allocation20_spill] sm:$0xff] %v5233_v35  ;;  %v5235_v40 = vpop.f32.mrb[63].mxu1 }
 0x1eb   :  { %5506 = vst [vmem:[#allocation21_spill] sm:$0xff] %v5235_v40  ;;  %v1404_v40 = vadd.f32 %v5053_v31, %v5240_v46  ;;  %v1410_v31 = vadd.f32 %v5061_v58, %v5240_v46 }
 0x1f5   :  { %v1978_v8 = vpop.f32.mrb[0].mxu0 }
 0x1f6   :  { %v3613_v35 = vadd.f32 %v1978_v8, %v1400_v55  ;;  %v1980_v54 = vpop.f32.mrb[1].mxu0 }
 0x1f7   :  { %v3615_v3 = vadd.f32 %v1980_v54, %v1402_v15  ;;  %v1982_v45 = vpop.f32.mrb[2].mxu0  ;;  %v1414_v15 = vadd.f32 %v5066_v60, %v5240_v46  ;;  %v4197_v60 = vld [vmem:[%s5487_s5 + $0x10] sm:$0xff]  }
 0x1f8   :  { %v3617_v32 = vadd.f32 %v1982_v45, %v1404_v40  ;;  %v1984_v47 = vpop.f32.mrb[3].mxu0  ;;  %v2137_v28 = vmax.f32 %v3613_v35, 0.0 }
 0x1f9   :  { %v3619_v48 = vadd.f32 %v1984_v47, %v1406_v62  ;;  %v2138_v27 = vmax.f32 %v3615_v3, 0.0  ;;  %v1416_v62 = vadd.f32 %v5069_v61, %v5242_v52  ;;  %v1420_v61 = vadd.f32 %v5074_v63, %v5240_v46 }
 0x1fa   :  { %v2139_v30 = vmax.f32 %v3617_v32, 0.0  ;;  %v4196_v32 = vld [vmem:[%s5487_s5 + $0x8] sm:$0xff]   ;;  %v1426_v63 = vadd.f32 %v5082_v34, %v5242_v52  ;;  %v1432_v34 = vadd.f32 %v5089_v37, %v5242_v52 }
 0x1fb   :  { %v2140_v26 = vmax.f32 %v3619_v48, 0.0 }
 0x1fc   :  { %v2201_v8 = vpack.c.bf16 %v2139_v30, %v2137_v28 }
 0x1fd   :  { %v2202_v54 = vpack.c.bf16 %v2140_v26, %v2138_v27  ;;  %v1988_v40 = vpop.f32.mrb[4].mxu0 }
 0x1fe   :  { %v3621_v55 = vadd.f32 %v1988_v40, %v1410_v31  ;;  %v1990_v45 = vpop.f32.mrb[5].mxu0  ;;  %v1422_v31 = vadd.f32 %v5076_v13, %v5242_v52 }
 0x1ff   :  { %v3623_v35 = vadd.f32 %v1990_v45, %v1412_v57  ;;  %v1992_v58 = vpop.f32.mrb[6].mxu0  ;;  %2400 = vmatprep.mubr.bf16.mxu1 %v2202_v54 }
 0x200   :  { %v3625_v28 = vadd.f32 %v1992_v58, %v1414_v15  ;;  %v1994_v3 = vpop.f32.mrb[7].mxu0  ;;  %2401 = vmatmul.mubr.bf16.vlgmr.msra.gmra.mrb[64].mxu1 %v2201_v8  ;;  %v2141_v26 = vmax.f32 %v3621_v55, 0.0  ;;  %v4198_v15 = vld [vmem:[%s5487_s5 + $0x18] sm:$0xff]  }
 0x201   :  { %v3627_v59 = vadd.f32 %v1994_v3, %v1416_v62  ;;  %3533 = vmatpush3.bf16.msra.mxu1 %v4195_v29  ;;  %v2142_v47 = vmax.f32 %v3623_v35, 0.0  ;;  %v1424_v29 = vadd.f32 %v5079_v33, %v5240_v46  ;;  %v1430_v3 = vadd.f32 %v5087_v36, %v5240_v46 }
 0x202   :  { %v2143_v27 = vmax.f32 %v3625_v28, 0.0  ;;  %3534 = vmatprep.subr.bf16.mxu1 %v4196_v32 }
 0x203   :  { %v2144_v48 = vmax.f32 %v3627_v59, 0.0 }
 0x204   :  { %v2203_v30 = vpack.c.bf16 %v2143_v27, %v2141_v26 }
 0x205   :  { %v2204_v57 = vpack.c.bf16 %v2144_v48, %v2142_v47  ;;  %v1998_v8 = vpop.f32.mrb[8].mxu0  ;;  %3535 = vmatpush3.bf16.msra.mxu1 %v4196_v32  ;;  %v1434_v47 = vadd.f32 %v5092_v38, %v5240_v46 }
 0x206   :  { %v3629_v54 = vadd.f32 %v1998_v8, %v1420_v61  ;;  %v2000_v40 = vpop.f32.mrb[9].mxu0  ;;  %3536 = vmatprep.subr.bf16.mxu1 %v4197_v60  ;;  %v1436_v61 = vadd.f32 %v5095_v39, %v5242_v52 }
 0x207   :  { %v3631_v55 = vadd.f32 %v2000_v40, %v1422_v31  ;;  %v2002_v45 = vpop.f32.mrb[10].mxu0  ;;  %2408 = vmatprep.mubr.bf16.mxu1 %v2204_v57 }
 0x208   :  { %v3633_v13 = vadd.f32 %v2002_v45, %v1424_v29  ;;  %v2004_v62 = vpop.f32.mrb[11].mxu0  ;;  %2409 = vmatmul.mubr.bf16.gmra.mrb[68].mxu1 %v2203_v30  ;;  %v2145_v35 = vmax.f32 %v3629_v54, 0.0  ;;  %v1444_v45 = vadd.f32 %v5105_v43, %v5240_v46 }
 0x209   :  { %v3635_v32 = vadd.f32 %v2004_v62, %v1426_v63  ;;  %3537 = vmatpush3.bf16.msra.mxu1 %v4197_v60  ;;  %v2146_v58 = vmax.f32 %v3631_v55, 0.0  ;;  %v1442_v63 = vadd.f32 %v5102_v42, %v5242_v52 }
 0x20a   :  { %v2147_v33 = vmax.f32 %v3633_v13, 0.0  ;;  %3538 = vmatprep.subr.bf16.mxu1 %v4198_v15 }
 0x20b   :  { %v2148_v28 = vmax.f32 %v3635_v32, 0.0  ;;  %v1446_v32 = vadd.f32 %v5108_v44, %v5242_v52 }
 0x20c   :  { %v2205_v59 = vpack.c.bf16 %v2147_v33, %v2145_v35 }
 0x20d   :  { %v2206_v26 = vpack.c.bf16 %v2148_v28, %v2146_v58  ;;  %v2008_v27 = vpop.f32.mrb[12].mxu0  ;;  %3539 = vmatpush3.bf16.msra.mxu1 %v4198_v15  ;;  %v1440_v15 = vadd.f32 %v5100_v41, %v5240_v46 }
 0x20e   :  { %v3637_v48 = vadd.f32 %v2008_v27, %v1430_v3  ;;  %v2010_v60 = vpop.f32.mrb[13].mxu0  ;;  %v1452_v27 = vadd.f32 %v5124_v50, %v5242_v52 }
 0x20f   :  { %v3639_v30 = vadd.f32 %v2010_v60, %v1432_v34  ;;  %v2012_v31 = vpop.f32.mrb[14].mxu0  ;;  %2416 = vmatprep.mubr.bf16.mxu1 %v2206_v26  ;;  %v1450_v26 = vadd.f32 %v5122_v49, %v5240_v46 }
 0x210   :  { %v3641_v57 = vadd.f32 %v2012_v31, %v1434_v47  ;;  %v2014_v36 = vpop.f32.mrb[15].mxu0  ;;  %2417 = vmatmul.mubr.bf16.gmra.mrb[72].mxu1 %v2205_v59  ;;  %v2149_v29 = vmax.f32 %v3637_v48, 0.0  ;;  %v1454_v48 = vadd.f32 %v5127_v51, %v5240_v46 }
 0x211   :  { %v3643_v8 = vadd.f32 %v2014_v36, %v1436_v61  ;;  %v2150_v54 = vmax.f32 %v3639_v30, 0.0  ;;  %v1456_v30 = vadd.f32 %v5133_v53, %v5242_v52 }
 0x212   :  { %v2151_v37 = vmax.f32 %v3641_v57, 0.0 }
 0x213   :  { %v2152_v40 = vmax.f32 %v3643_v8, 0.0 }
 0x214   :  { %v2207_v38 = vpack.c.bf16 %v2151_v37, %v2149_v29 }
 0x215   :  { %v2208_v55 = vpack.c.bf16 %v2152_v40, %v2150_v54  ;;  %v2018_v39 = vpop.f32.mrb[16].mxu0  ;;  %v1460_v40 = vadd.f32 %v5141_v0, %v5240_v46 }
 0x216   :  { %v3645_v13 = vadd.f32 %v2018_v39, %v1440_v15  ;;  %v2020_v62 = vpop.f32.mrb[17].mxu0  ;;  %v1462_v15 = vadd.f32 %v5143_v1, %v5242_v52 }
 0x217   :  { %v3647_v35 = vadd.f32 %v2020_v62, %v1442_v63  ;;  %v2022_v33 = vpop.f32.mrb[18].mxu0  ;;  %2424 = vmatprep.mubr.bf16.mxu1 %v2208_v55  ;;  %v1464_v63 = vadd.f32 %v5146_v56, %v5240_v46 }
 0x218   :  { %v3649_v58 = vadd.f32 %v2022_v33, %v1444_v45  ;;  %v2024_v28 = vpop.f32.mrb[19].mxu0  ;;  %2425 = vmatmul.mubr.bf16.gmra.mrb[76].mxu1 %v2207_v38  ;;  %v2153_v3 = vmax.f32 %v3645_v13, 0.0  ;;  %v1466_v45 = vadd.f32 %v5149_v2, %v5242_v52 }
 0x219   :  { %v3651_v41 = vadd.f32 %v2024_v28, %v1446_v32  ;;  %v2154_v42 = vmax.f32 %v3647_v35, 0.0 }
 0x21a   :  { %v2155_v59 = vmax.f32 %v3649_v58, 0.0 }
 0x21b   :  { %v2156_v34 = vmax.f32 %v3651_v41, 0.0  ;;  %v1470_v41 = vadd.f32 %v5154_v4, %v5240_v46 }
 0x21c   :  { %v2209_v43 = vpack.c.bf16 %v2155_v59, %v2153_v3  ;;  %v1472_v3 = vadd.f32 %v5156_v5, %v5242_v52 }
 0x21d   :  { %v2210_v47 = vpack.c.bf16 %v2156_v34, %v2154_v42  ;;  %v2028_v44 = vpop.f32.mrb[20].mxu0  ;;  %v1474_v42 = vadd.f32 %v5159_v6, %v5240_v46 }
 0x21e   :  { %v3653_v60 = vadd.f32 %v2028_v44, %v1450_v26  ;;  %v2030_v61 = vpop.f32.mrb[21].mxu0 }
 0x21f   :  { %v3655_v31 = vadd.f32 %v2030_v61, %v1452_v27  ;;  %v2032_v57 = vpop.f32.mrb[22].mxu0  ;;  %2432 = vmatprep.mubr.bf16.mxu1 %v2210_v47 }
 0x220   :  { %v3657_v36 = vadd.f32 %v2032_v57, %v1454_v48  ;;  %v2034_v8 = vpop.f32.mrb[23].mxu0  ;;  %2433 = vmatmul.mubr.bf16.gmra.mrb[80].mxu1 %v2209_v43  ;;  %v2157_v29 = vmax.f32 %v3653_v60, 0.0  ;;  %v1476_v43 = vadd.f32 %v5162_v7, %v5242_v52  ;;  %v1482_v57 = vadd.f32 %v5169_v10, %v5242_v52 }
 0x221   :  { %v3659_v49 = vadd.f32 %v2034_v8, %v1456_v30  ;;  %v2158_v50 = vmax.f32 %v3655_v31, 0.0  ;;  %v1480_v31 = vadd.f32 %v5167_v9, %v5240_v46  ;;  %v1484_v8 = vadd.f32 %v5172_v12, %v5240_v46 }
 0x222   :  { %v2159_v37 = vmax.f32 %v3657_v36, 0.0 }
 0x223   :  { %v2160_v54 = vmax.f32 %v3659_v49, 0.0 }
 0x224   :  { %v2211_v51 = vpack.c.bf16 %v2159_v37, %v2157_v29  ;;  %v1486_v37 = vadd.f32 %v5175_v14, %v5242_v52 }
 0x225   :  { %v2212_v38 = vpack.c.bf16 %v2160_v54, %v2158_v50  ;;  %v2038_v53 = vpop.f32.mrb[24].mxu0 }
 0x226   :  { %v3661_v55 = vadd.f32 %v2038_v53, %v1460_v40  ;;  %v2040_v39 = vpop.f32.mrb[25].mxu0 }
 0x227   :  { %v3663_v13 = vadd.f32 %v2040_v39, %v1462_v15  ;;  %v2042_v62 = vpop.f32.mrb[26].mxu0  ;;  %2440 = vmatprep.mubr.bf16.mxu1 %v2212_v38 }
 0x228   :  { %v3665_v32 = vadd.f32 %v2042_v62, %v1464_v63  ;;  %v2044_v35 = vpop.f32.mrb[27].mxu0  ;;  %2441 = vmatmul.mubr.bf16.gmra.mrb[84].mxu1 %v2211_v51  ;;  %v2161_v33 = vmax.f32 %v3661_v55, 0.0  ;;  %v1490_v63 = vadd.f32 %v5180_v16, %v5240_v46  ;;  %v1492_v55 = vadd.f32 %v5182_v17, %v5242_v52 }
 0x229   :  { %v3667_v0 = vadd.f32 %v2044_v35, %v1466_v45  ;;  %v2162_v1 = vmax.f32 %v3663_v13, 0.0  ;;  %v1494_v45 = vadd.f32 %v5185_v18, %v5240_v46 }
 0x22a   :  { %v2163_v58 = vmax.f32 %v3665_v32, 0.0  ;;  %v1496_v32 = vadd.f32 %v5187_v19, %v5242_v52 }
 0x22b   :  { %v2164_v28 = vmax.f32 %v3667_v0, 0.0 }
 0x22c   :  { %v2213_v56 = vpack.c.bf16 %v2163_v58, %v2161_v33 }
 0x22d   :  { %v2214_v59 = vpack.c.bf16 %v2164_v28, %v2162_v1  ;;  %v2048_v2 = vpop.f32.mrb[28].mxu0 }
 0x22e   :  { %v3669_v34 = vadd.f32 %v2048_v2, %v1470_v41  ;;  %v2050_v26 = vpop.f32.mrb[29].mxu0  ;;  %v1504_v2 = vadd.f32 %v5193_v11, %v5240_v46 }
 0x22f   :  { %v3671_v27 = vadd.f32 %v2050_v26, %v1472_v3  ;;  %v2052_v47 = vpop.f32.mrb[30].mxu0  ;;  %2448 = vmatprep.mubr.bf16.mxu1 %v2214_v59  ;;  %v1502_v3 = vadd.f32 %v5191_v21, %v5242_v52  ;;  %v1506_v26 = vadd.f32 %v5195_v22, %v5242_v52 }
 0x230   :  { %v3673_v44 = vadd.f32 %v2052_v47, %v1474_v42  ;;  %v2054_v48 = vpop.f32.mrb[31].mxu0  ;;  %2449 = vmatmul.mubr.bf16.gmra.mrb[88].mxu1 %v2213_v56  ;;  %v2165_v60 = vmax.f32 %v3669_v34, 0.0  ;;  %v1500_v56 = vadd.f32 %v5189_v20, %v5240_v46 }
 0x231   :  { %v3675_v4 = vadd.f32 %v2054_v48, %v1476_v43  ;;  %v2166_v5 = vmax.f32 %v3671_v27, 0.0 }
 0x232   :  { %v2167_v61 = vmax.f32 %v3673_v44, 0.0 }
 0x233   :  { %v2168_v30 = vmax.f32 %v3675_v4, 0.0 }
 0x234   :  { %v2215_v6 = vpack.c.bf16 %v2167_v61, %v2165_v60  ;;  %v1510_v61 = vadd.f32 %v5197_v23, %v5240_v46 }
 0x235   :  { %v2216_v36 = vpack.c.bf16 %v2168_v30, %v2166_v5  ;;  %v2058_v7 = vpop.f32.mrb[32].mxu0  ;;  %v1512_v5 = vadd.f32 %v5199_v24, %v5242_v52 }
 0x236   :  { %v3677_v49 = vadd.f32 %v2058_v7, %v1480_v31  ;;  %v2060_v29 = vpop.f32.mrb[33].mxu0  ;;  %v1514_v31 = vadd.f32 %v5201_v25, %v5240_v46 }
 0x237   :  { %v3679_v50 = vadd.f32 %v2060_v29, %v1482_v57  ;;  %v2062_v54 = vpop.f32.mrb[34].mxu0  ;;  %2456 = vmatprep.mubr.bf16.mxu1 %v2216_v36  ;;  %v5507_v36 = vld [vmem:[#allocation5_spill] sm:$0xff] }
 0x238   :  { %v3681_v40 = vadd.f32 %v2062_v54, %v1484_v8  ;;  %v2064_v51 = vpop.f32.mrb[35].mxu0  ;;  %2457 = vmatmul.mubr.bf16.gmra.mrb[92].mxu1 %v2215_v6  ;;  %v2169_v15 = vmax.f32 %v3677_v49, 0.0  ;;  %v1516_v7 = vadd.f32 %v5507_v36, %v5242_v52  ;;  %v5517_v36 = vld [vmem:[#allocation15_spill] sm:$0xff] }
 0x239   :  { %v3683_v9 = vadd.f32 %v2064_v51, %v1486_v37  ;;  %v2170_v10 = vmax.f32 %v3679_v50, 0.0  ;;  %v5508_v51 = vld [vmem:[#allocation6_spill] sm:$0xff] }
 0x23a   :  { %v2171_v38 = vmax.f32 %v3681_v40, 0.0 }
 0x23b   :  { %v2172_v53 = vmax.f32 %v3683_v9, 0.0  ;;  %v3708_v9 = vadd.f32 %v5508_v51, %v5240_v46 }
 0x23c   :  { %v2217_v12 = vpack.c.bf16 %v2171_v38, %v2169_v15  ;;  %v5509_v15 = vld [vmem:[#allocation7_spill] sm:$0xff] }
 0x23d   :  { %v2218_v39 = vpack.c.bf16 %v2172_v53, %v2170_v10  ;;  %v2068_v14 = vpop.f32.mrb[36].mxu0  ;;  %v3710_v38 = vadd.f32 %v5509_v15, %v5242_v52 }
 0x23e   :  { %v3685_v13 = vadd.f32 %v2068_v14, %v1490_v63  ;;  %v2070_v62 = vpop.f32.mrb[37].mxu0  ;;  %v4199_v63 = vld [vmem:[%s5487_s5 + $0x20] sm:$0xff]  }
 0x23f   :  { %v3687_v35 = vadd.f32 %v2070_v62, %v1492_v55  ;;  %v2072_v0 = vpop.f32.mrb[38].mxu0  ;;  %2464 = vmatprep.mubr.bf16.mxu1 %v2218_v39  ;;  %3540 = vmatprep.subr.bf16.mxu1 %v4199_v63 }
 0x240   :  { %v3689_v33 = vadd.f32 %v2072_v0, %v1494_v45  ;;  %v2074_v58 = vpop.f32.mrb[39].mxu0  ;;  %2465 = vmatmul.mubr.bf16.gmra.mrb[96].mxu1 %v2217_v12  ;;  %v2173_v1 = vmax.f32 %v3685_v13, 0.0  ;;  %v5510_v12 = vld [vmem:[#allocation8_spill] sm:$0xff]  ;;  %v5511_v45 = vld [vmem:[#allocation9_spill] sm:$0xff] }
 0x241   :  { %v3691_v16 = vadd.f32 %v2074_v58, %v1496_v32  ;;  %v2174_v17 = vmax.f32 %v3687_v35, 0.0  ;;  %v3712_v55 = vadd.f32 %v5510_v12, %v5240_v46  ;;  %v3714_v13 = vadd.f32 %v5511_v45, %v5242_v52  ;;  %3541 = vmatpush3.bf16.msra.mxu1 %v4199_v63  ;;  %v4200_v58 = vld [vmem:[%s5487_s5 + $0x28] sm:$0xff]  }
 0x242   :  { %v2175_v28 = vmax.f32 %v3689_v33, 0.0  ;;  %3542 = vmatprep.subr.bf16.mxu1 %v4200_v58  ;;  %v5520_v12 = vld [vmem:[#allocation18_spill] sm:$0xff] }
 0x243   :  { %v2176_v41 = vmax.f32 %v3691_v16, 0.0 }
 0x244   :  { %v2219_v18 = vpack.c.bf16 %v2175_v28, %v2173_v1 }
 0x245   :  { %v2220_v59 = vpack.c.bf16 %v2176_v41, %v2174_v17  ;;  %v2078_v19 = vpop.f32.mrb[40].mxu0  ;;  %v5512_v41 = vld [vmem:[#allocation10_spill] sm:$0xff]  ;;  %3543 = vmatpush3.bf16.msra.mxu1 %v4200_v58  ;;  %v5523_v58 = vld [vmem:[#allocation21_spill] sm:$0xff] }
 0x246   :  { %v3693_v42 = vadd.f32 %v2078_v19, %v1500_v56  ;;  %v2080_v34 = vpop.f32.mrb[41].mxu0  ;;  %v3716_v56 = vadd.f32 %v5512_v41, %v5240_v46 }
 0x247   :  { %v3695_v43 = vadd.f32 %v2080_v34, %v1502_v3  ;;  %v2082_v27 = vpop.f32.mrb[42].mxu0  ;;  %2472 = vmatprep.mubr.bf16.mxu1 %v2220_v59  ;;  %v5513_v3 = vld [vmem:[#allocation11_spill] sm:$0xff]  ;;  %v5514_v34 = vld [vmem:[#allocation12_spill] sm:$0xff] }
 0x248   :  { %v3697_v47 = vadd.f32 %v2082_v27, %v1504_v2  ;;  %v2084_v44 = vpop.f32.mrb[43].mxu0  ;;  %2473 = vmatmul.mubr.bf16.gmra.mrb[100].mxu1 %v2219_v18  ;;  %v2177_v48 = vmax.f32 %v3693_v42, 0.0  ;;  %v3718_v59 = vadd.f32 %v5513_v3, %v5242_v52  ;;  %v4201_v42 = vld [vmem:[%s5487_s5 + $0x30] sm:$0xff]  }
 0x249   :  { %v3699_v20 = vadd.f32 %v2084_v44, %v1506_v26  ;;  %v2178_v21 = vmax.f32 %v3695_v43, 0.0  ;;  %v3720_v26 = vadd.f32 %v5514_v34, %v5240_v46  ;;  %3544 = vmatprep.subr.bf16.mxu1 %v4201_v42 }
 0x24a   :  { %v2179_v4 = vmax.f32 %v3697_v47, 0.0  ;;  %v5515_v47 = vld [vmem:[#allocation13_spill] sm:$0xff]  ;;  %3545 = vmatpush3.bf16.msra.mxu1 %v4201_v42 }
 0x24b   :  { %v2180_v60 = vmax.f32 %v3699_v20, 0.0  ;;  %v3722_v44 = vadd.f32 %v5515_v47, %v5242_v52 }
 0x24c   :  { %v2221_v11 = vpack.c.bf16 %v2179_v4, %v2177_v48 }
 0x24d   :  { %v2222_v30 = vpack.c.bf16 %v2180_v60, %v2178_v21  ;;  %v2088_v22 = vpop.f32.mrb[44].mxu0 }
 0x24e   :  { %v3701_v6 = vadd.f32 %v2088_v22, %v1510_v61  ;;  %v2090_v57 = vpop.f32.mrb[45].mxu0  ;;  %v4202_v61 = vld [vmem:[%s5487_s5 + $0x38] sm:$0xff]  }
 0x24f   :  { %v3703_v8 = vadd.f32 %v2090_v57, %v1512_v5  ;;  %v2092_v49 = vpop.f32.mrb[46].mxu0  ;;  %2480 = vmatprep.mubr.bf16.mxu1 %v2222_v30  ;;  %3546 = vmatprep.subr.bf16.mxu1 %v4202_v61 }
 0x250   :  { %v3705_v29 = vadd.f32 %v2092_v49, %v1514_v31  ;;  %v2094_v37 = vpop.f32.mrb[47].mxu0  ;;  %2481 = vmatmul.mubr.bf16.gmra.mrb[104].mxu1 %v2221_v11  ;;  %v2181_v50 = vmax.f32 %v3701_v6, 0.0  ;;  %v5516_v31 = vld [vmem:[#allocation14_spill] sm:$0xff] }
 0x251   :  { %v3707_v23 = vadd.f32 %v2094_v37, %v1516_v7  ;;  %v2182_v24 = vmax.f32 %v3703_v8, 0.0  ;;  %v3724_v6 = vadd.f32 %v5516_v31, %v5240_v46  ;;  %v3726_v7 = vadd.f32 %v5517_v36, %v5242_v52  ;;  %3547 = vmatpush3.bf16.msra.mxu1 %v4202_v61 }
 0x252   :  { %v2183_v54 = vmax.f32 %v3705_v29, 0.0  ;;  %v5518_v29 = vld [vmem:[#allocation16_spill] sm:$0xff] }
 0x253   :  { %v2184_v40 = vmax.f32 %v3707_v23, 0.0  ;;  %v3728_v37 = vadd.f32 %v5518_v29, %v5240_v46 }
 0x254   :  { %v2223_v25 = vpack.c.bf16 %v2183_v54, %v2181_v50  ;;  %v5519_v54 = vld [vmem:[#allocation17_spill] sm:$0xff] }
 0x255   :  { %v2224_v10 = vpack.c.bf16 %v2184_v40, %v2182_v24  ;;  %v2098_v53 = vpop.f32.mrb[48].mxu0  ;;  %v3730_v24 = vadd.f32 %v5519_v54, %v5242_v52 }
 0x256   :  { %v3709_v39 = vadd.f32 %v3708_v9, %v2098_v53  ;;  %v2100_v14 = vpop.f32.mrb[49].mxu0 }
 0x257   :  { %v3711_v62 = vadd.f32 %v3710_v38, %v2100_v14  ;;  %v2102_v32 = vpop.f32.mrb[50].mxu0  ;;  %2488 = vmatprep.mubr.bf16.mxu1 %v2224_v10  ;;  %v5521_v14 = vld [vmem:[#allocation19_spill] sm:$0xff] }
 0x258   :  { %v3713_v35 = vadd.f32 %v3712_v55, %v2102_v32  ;;  %v2104_v0 = vpop.f32.mrb[51].mxu0  ;;  %2489 = vmatmul.mubr.bf16.gmra.mrb[108].mxu1 %v2223_v25  ;;  %v2185_v16 = vmax.f32 %v3709_v39, 0.0  ;;  %v3732_v55 = vadd.f32 %v5520_v12, %v5240_v46  ;;  %v3734_v45 = vadd.f32 %v5521_v14, %v5242_v52  ;;  %v5522_v32 = vld [vmem:[#allocation20_spill] sm:$0xff] }
 0x259   :  { %v3715_v33 = vadd.f32 %v3714_v13, %v2104_v0  ;;  %v2186_v28 = vmax.f32 %v3711_v62, 0.0 }
 0x25a   :  { %v2187_v1 = vmax.f32 %v3713_v35, 0.0  ;;  %v3736_v35 = vadd.f32 %v5522_v32, %v5240_v46 }
 0x25b   :  { %v2188_v17 = vmax.f32 %v3715_v33, 0.0 }
 0x25c   :  { %v2225_v18 = vpack.c.bf16 %v2187_v1, %v2185_v16  ;;  %v3738_v16 = vadd.f32 %v5523_v58, %v5242_v52  ;;  %v5399_v52 = vld [vmem:[%s5486_s4] ss:$0 sm:$0xff] }
 0x25d   :  { %v2226_v19 = vpack.c.bf16 %v2188_v17, %v2186_v28  ;;  %v2108_v2 = vpop.f32.mrb[52].mxu0 }
 0x25e   :  { %v3717_v43 = vadd.f32 %v3716_v56, %v2108_v2  ;;  %v2110_v27 = vpop.f32.mrb[53].mxu0 }
 0x25f   :  { %v3719_v20 = vadd.f32 %v3718_v59, %v2110_v27  ;;  %v2112_v48 = vpop.f32.mrb[54].mxu0  ;;  %2496 = vmatprep.mubr.bf16.mxu1 %v2226_v19 }
 0x260   :  { %v3721_v4 = vadd.f32 %v3720_v26, %v2112_v48  ;;  %v2114_v21 = vpop.f32.mrb[55].mxu0  ;;  %2497 = vmatmul.mubr.bf16.gmra.mrb[112].mxu1 %v2225_v18  ;;  %v2189_v11 = vmax.f32 %v3717_v43, 0.0 }
 0x261   :  { %v3723_v60 = vadd.f32 %v3722_v44, %v2114_v21  ;;  %v2190_v30 = vmax.f32 %v3719_v20, 0.0 }
 0x262   :  { %v2191_v5 = vmax.f32 %v3721_v4, 0.0 }
 0x263   :  { %v2192_v22 = vmax.f32 %v3723_v60, 0.0 }
 0x264   :  { %v2227_v57 = vpack.c.bf16 %v2191_v5, %v2189_v11 }
 0x265   :  { %v2228_v8 = vpack.c.bf16 %v2192_v22, %v2190_v30  ;;  %v2118_v49 = vpop.f32.mrb[56].mxu0 }
 0x266   :  { %v3725_v23 = vadd.f32 %v3724_v6, %v2118_v49  ;;  %v2120_v50 = vpop.f32.mrb[57].mxu0 }
 0x267   :  { %v3727_v40 = vadd.f32 %v3726_v7, %v2120_v50  ;;  %v2122_v51 = vpop.f32.mrb[58].mxu0  ;;  %2504 = vmatprep.mubr.bf16.mxu1 %v2228_v8 }
 0x268   :  { %v3729_v9 = vadd.f32 %v3728_v37, %v2122_v51  ;;  %v2124_v25 = vpop.f32.mrb[59].mxu0  ;;  %2505 = vmatmul.mubr.bf16.gmra.mrb[116].mxu1 %v2227_v57  ;;  %v2193_v38 = vmax.f32 %v3725_v23, 0.0 }
 0x269   :  { %v3731_v15 = vadd.f32 %v3730_v24, %v2124_v25  ;;  %v2194_v53 = vmax.f32 %v3727_v40, 0.0 }
 0x26a   :  { %v2195_v10 = vmax.f32 %v3729_v9, 0.0 }
 0x26b   :  { %v2196_v63 = vmax.f32 %v3731_v15, 0.0 }
 0x26c   :  { %v2229_v39 = vpack.c.bf16 %v2195_v10, %v2193_v38 }
 0x26d   :  { %v2230_v13 = vpack.c.bf16 %v2196_v63, %v2194_v53  ;;  %v2128_v62 = vpop.f32.mrb[60].mxu0 }
 0x26e   :  { %v3733_v0 = vadd.f32 %v3732_v55, %v2128_v62  ;;  %v2130_v33 = vpop.f32.mrb[61].mxu0 }
 0x26f   :  { %v3735_v1 = vadd.f32 %v3734_v45, %v2130_v33  ;;  %v2132_v28 = vpop.f32.mrb[62].mxu0  ;;  %2512 = vmatprep.mubr.bf16.mxu1 %v2230_v13 }
 0x270   :  { %v3737_v17 = vadd.f32 %v3736_v35, %v2132_v28  ;;  %v2134_v41 = vpop.f32.mrb[63].mxu0  ;;  %2513 = vmatmul.mubr.bf16.gmra.mrb[120].mxu1 %v2229_v39  ;;  %v2197_v18 = vmax.f32 %v3733_v0, 0.0 }
 0x271   :  { %v3739_v56 = vadd.f32 %v3738_v16, %v2134_v41  ;;  %v2198_v59 = vmax.f32 %v3735_v1, 0.0 }
 0x272   :  { %v2199_v3 = vmax.f32 %v3737_v17, 0.0 }
 0x273   :  { %v2200_v19 = vmax.f32 %v3739_v56, 0.0 }
 0x274   :  { %v2231_v2 = vpack.c.bf16 %v2199_v3, %v2197_v18 }
 0x275   :  { %v2232_v42 = vpack.c.bf16 %v2200_v19, %v2198_v59 }
 0x277   :  { %2520 = vmatprep.mubr.bf16.mxu1 %v2232_v42 }
 0x278   :  { %2521 = vmatmul.mubr.bf16.gmra.mrb[124].mxu1 %v2231_v2 }
 0x2d3   :  { %v3412_v46 = vpop.f32.mrb[64].mxu1 }
 0x2d4   :  { %v3413_v34 = vpop.f32.mrb[65].mxu1 }
 0x2d5   :  { %v3414_v26 = vadd.f32 %v3413_v34, %v3412_v46  ;;  %v3415_v43 = vpop.f32.mrb[66].mxu1 }
 0x2d6   :  { %v3416_v27 = vpop.f32.mrb[67].mxu1 }
 0x2d7   :  { %v2403_v47 = vadd.f32 %v3414_v26, %v5399_v52  ;;  %v3417_v44 = vadd.f32 %v3416_v27, %v3415_v43 }
 0x2d9   :  { %v2406_v20 = vadd.f32 %v3417_v44, %v5399_v52  ;;  %v2529_v48 = vmax.f32 %v2403_v47, 0.0 }
 0x2db   :  { %v2530_v4 = vmax.f32 %v2406_v20, 0.0  ;;  %v3418_v21 = vpop.f32.mrb[68].mxu1 }
 0x2dc   :  { %v3419_v60 = vpop.f32.mrb[69].mxu1 }
 0x2dd   :  { %v3420_v61 = vadd.f32 %v3419_v60, %v3418_v21  ;;  %v3421_v11 = vpop.f32.mrb[70].mxu1  ;;  %v2561_v5 = vpack.c.bf16 %v2530_v4, %v2529_v48 }
 0x2de   :  { %v3422_v30 = vpop.f32.mrb[71].mxu1 }
 0x2df   :  { %v2411_v22 = vadd.f32 %v3420_v61, %v5399_v52  ;;  %v3423_v31 = vadd.f32 %v3422_v30, %v3421_v11  ;;  %3548 = vmatprep.mubr.bf16.mxu1 %v2561_v5 }
 0x2e1   :  { %v2414_v6 = vadd.f32 %v3423_v31, %v5399_v52  ;;  %v2531_v57 = vmax.f32 %v2411_v22, 0.0 }
 0x2e3   :  { %v2532_v36 = vmax.f32 %v2414_v6, 0.0  ;;  %v3424_v7 = vpop.f32.mrb[72].mxu1 }
 0x2e4   :  { %v3425_v8 = vpop.f32.mrb[73].mxu1 }
 0x2e5   :  { %v2562_v49 = vpack.c.bf16 %v2532_v36, %v2531_v57  ;;  %v3426_v29 = vadd.f32 %v3425_v8, %v3424_v7  ;;  %v3427_v37 = vpop.f32.mrb[74].mxu1 }
 0x2e6   :  { %v3428_v23 = vpop.f32.mrb[75].mxu1 }
 0x2e7   :  { %v2419_v50 = vadd.f32 %v3426_v29, %v5399_v52  ;;  %v3429_v54 = vadd.f32 %v3428_v23, %v3427_v37  ;;  %3549 = vmatmul.mubr.bf16.vlgmr.msra.gmra.mrb[128].mxu1 %v2562_v49 }
 0x2e9   :  { %v2422_v24 = vadd.f32 %v3429_v54, %v5399_v52  ;;  %v2533_v40 = vmax.f32 %v2419_v50, 0.0 }
 0x2eb   :  { %v2534_v51 = vmax.f32 %v2422_v24, 0.0  ;;  %v3430_v9 = vpop.f32.mrb[76].mxu1 }
 0x2ec   :  { %v3431_v25 = vpop.f32.mrb[77].mxu1 }
 0x2ed   :  { %v3432_v15 = vadd.f32 %v3431_v25, %v3430_v9  ;;  %v3433_v38 = vpop.f32.mrb[78].mxu1  ;;  %v2563_v10 = vpack.c.bf16 %v2534_v51, %v2533_v40 }
 0x2ee   :  { %v3434_v53 = vpop.f32.mrb[79].mxu1 }
 0x2ef   :  { %v2427_v63 = vadd.f32 %v3432_v15, %v5399_v52  ;;  %v3435_v12 = vadd.f32 %v3434_v53, %v3433_v38  ;;  %3552 = vmatprep.mubr.bf16.mxu1 %v2563_v10 }
 0x2f1   :  { %v2430_v55 = vadd.f32 %v3435_v12, %v5399_v52  ;;  %v2535_v39 = vmax.f32 %v2427_v63, 0.0 }
 0x2f3   :  { %v2536_v14 = vmax.f32 %v2430_v55, 0.0  ;;  %v3436_v45 = vpop.f32.mrb[80].mxu1 }
 0x2f4   :  { %v3437_v13 = vpop.f32.mrb[81].mxu1 }
 0x2f5   :  { %v3438_v62 = vadd.f32 %v3437_v13, %v3436_v45  ;;  %v3439_v32 = vpop.f32.mrb[82].mxu1  ;;  %v2564_v35 = vpack.c.bf16 %v2536_v14, %v2535_v39 }
 0x2f6   :  { %v3440_v0 = vpop.f32.mrb[83].mxu1 }
 0x2f7   :  { %v2435_v33 = vadd.f32 %v3438_v62, %v5399_v52  ;;  %v3441_v58 = vadd.f32 %v3440_v0, %v3439_v32  ;;  %3553 = vmatmul.mubr.bf16.gmra.mrb[132].mxu1 %v2564_v35 }
 0x2f9   :  { %v2438_v16 = vadd.f32 %v3441_v58, %v5399_v52  ;;  %v2537_v1 = vmax.f32 %v2435_v33, 0.0 }
 0x2fb   :  { %v2538_v28 = vmax.f32 %v2438_v16, 0.0  ;;  %v3442_v17 = vpop.f32.mrb[84].mxu1 }
 0x2fc   :  { %v3443_v41 = vpop.f32.mrb[85].mxu1 }
 0x2fd   :  { %v3444_v56 = vadd.f32 %v3443_v41, %v3442_v17  ;;  %v3445_v18 = vpop.f32.mrb[86].mxu1  ;;  %v2565_v3 = vpack.c.bf16 %v2538_v28, %v2537_v1 }
 0x2fe   :  { %v3446_v59 = vpop.f32.mrb[87].mxu1 }
 0x2ff   :  { %v2443_v19 = vadd.f32 %v3444_v56, %v5399_v52  ;;  %v3447_v2 = vadd.f32 %v3446_v59, %v3445_v18  ;;  %3556 = vmatprep.mubr.bf16.mxu1 %v2565_v3 }
 0x301   :  { %v2446_v42 = vadd.f32 %v3447_v2, %v5399_v52  ;;  %v2539_v46 = vmax.f32 %v2443_v19, 0.0 }
 0x303   :  { %v2540_v34 = vmax.f32 %v2446_v42, 0.0  ;;  %v3448_v26 = vpop.f32.mrb[88].mxu1 }
 0x304   :  { %v3449_v43 = vpop.f32.mrb[89].mxu1 }
 0x305   :  { %v3450_v27 = vadd.f32 %v3449_v43, %v3448_v26  ;;  %v3451_v47 = vpop.f32.mrb[90].mxu1  ;;  %v2566_v44 = vpack.c.bf16 %v2540_v34, %v2539_v46 }
 0x306   :  { %v3452_v20 = vpop.f32.mrb[91].mxu1 }
 0x307   :  { %v2451_v48 = vadd.f32 %v3450_v27, %v5399_v52  ;;  %v3453_v4 = vadd.f32 %v3452_v20, %v3451_v47  ;;  %3557 = vmatmul.mubr.bf16.gmra.mrb[136].mxu1 %v2566_v44 }
 0x309   :  { %v2454_v21 = vadd.f32 %v3453_v4, %v5399_v52  ;;  %v2541_v60 = vmax.f32 %v2451_v48, 0.0 }
 0x30b   :  { %v2542_v61 = vmax.f32 %v2454_v21, 0.0  ;;  %v3454_v11 = vpop.f32.mrb[92].mxu1 }
 0x30c   :  { %v3455_v5 = vpop.f32.mrb[93].mxu1 }
 0x30d   :  { %v3456_v30 = vadd.f32 %v3455_v5, %v3454_v11  ;;  %v3457_v22 = vpop.f32.mrb[94].mxu1  ;;  %v2567_v31 = vpack.c.bf16 %v2542_v61, %v2541_v60 }
 0x30e   :  { %v3458_v6 = vpop.f32.mrb[95].mxu1 }
 0x30f   :  { %v2459_v57 = vadd.f32 %v3456_v30, %v5399_v52  ;;  %v3459_v36 = vadd.f32 %v3458_v6, %v3457_v22  ;;  %3560 = vmatprep.mubr.bf16.mxu1 %v2567_v31 }
 0x311   :  { %v2462_v7 = vadd.f32 %v3459_v36, %v5399_v52  ;;  %v2543_v8 = vmax.f32 %v2459_v57, 0.0 }
 0x313   :  { %v2544_v49 = vmax.f32 %v2462_v7, 0.0  ;;  %v3460_v29 = vpop.f32.mrb[96].mxu1 }
 0x314   :  { %v3461_v37 = vpop.f32.mrb[97].mxu1 }
 0x315   :  { %v3462_v23 = vadd.f32 %v3461_v37, %v3460_v29  ;;  %v3463_v50 = vpop.f32.mrb[98].mxu1  ;;  %v2568_v54 = vpack.c.bf16 %v2544_v49, %v2543_v8 }
 0x316   :  { %v3464_v24 = vpop.f32.mrb[99].mxu1 }
 0x317   :  { %v2467_v40 = vadd.f32 %v3462_v23, %v5399_v52  ;;  %v3465_v51 = vadd.f32 %v3464_v24, %v3463_v50  ;;  %3561 = vmatmul.mubr.bf16.gmra.mrb[140].mxu1 %v2568_v54 }
 0x319   :  { %v2470_v9 = vadd.f32 %v3465_v51, %v5399_v52  ;;  %v2545_v25 = vmax.f32 %v2467_v40, 0.0 }
 0x31b   :  { %v2546_v15 = vmax.f32 %v2470_v9, 0.0  ;;  %v3466_v38 = vpop.f32.mrb[100].mxu1 }
 0x31c   :  { %v3467_v10 = vpop.f32.mrb[101].mxu1 }
 0x31d   :  { %v3468_v53 = vadd.f32 %v3467_v10, %v3466_v38  ;;  %v3469_v63 = vpop.f32.mrb[102].mxu1  ;;  %v2569_v12 = vpack.c.bf16 %v2546_v15, %v2545_v25 }
 0x31e   :  { %v3470_v55 = vpop.f32.mrb[103].mxu1 }
 0x31f   :  { %v2475_v39 = vadd.f32 %v3468_v53, %v5399_v52  ;;  %v3471_v14 = vadd.f32 %v3470_v55, %v3469_v63  ;;  %3564 = vmatprep.mubr.bf16.mxu1 %v2569_v12 }
 0x321   :  { %v2478_v45 = vadd.f32 %v3471_v14, %v5399_v52  ;;  %v2547_v13 = vmax.f32 %v2475_v39, 0.0 }
 0x323   :  { %v2548_v62 = vmax.f32 %v2478_v45, 0.0  ;;  %v3472_v32 = vpop.f32.mrb[104].mxu1 }
 0x324   :  { %v3473_v35 = vpop.f32.mrb[105].mxu1 }
 0x325   :  { %v3474_v0 = vadd.f32 %v3473_v35, %v3472_v32  ;;  %v3475_v33 = vpop.f32.mrb[106].mxu1  ;;  %v2570_v58 = vpack.c.bf16 %v2548_v62, %v2547_v13 }
 0x326   :  { %v3476_v16 = vpop.f32.mrb[107].mxu1 }
 0x327   :  { %v2483_v1 = vadd.f32 %v3474_v0, %v5399_v52  ;;  %v3477_v28 = vadd.f32 %v3476_v16, %v3475_v33  ;;  %3565 = vmatmul.mubr.bf16.gmra.mrb[144].mxu1 %v2570_v58  ;;  %v5436_v16 = vld [vmem:[%s5488_s6] ss:$0 sm:$0xff]  ;;  %s4228_s6 = smov [#allocation2]  }
 0x328   :  { %s2974_s24 = sshll.u32 %s4228_s6, 4  ;;  %s2975_s24 = int_to_ptr.vmem [resolvable:$true] %s2974_s24 }
 0x329   :  { %v2486_v17 = vadd.f32 %v3477_v28, %v5399_v52  ;;  %v2549_v41 = vmax.f32 %v2483_v1, 0.0  ;;  %s4203_s25 = scalar_lea.vmem %s2975_s24, 2048  ;;  %p4208_p1 = scmp.lt.s32.totalorder %s2975_s24, %s2975_s24 }
 0x32a   :  { %p4204_p0 = scmp.ne.s32.totalorder %s2975_s24, %s4203_s25  ;;  %p4209_p2 = scmp.lt.s32.totalorder %s4203_s25, %s4203_s25 }
 0x32b   :  { %v2550_v56 = vmax.f32 %v2486_v17, 0.0  ;;  %v3478_v18 = vpop.f32.mrb[108].mxu1 }
 0x32c   :  { %v3479_v3 = vpop.f32.mrb[109].mxu1  ;;  %p4210_p3 = por %p4209_p2, %p4208_p1 }
 0x32d   :  { %v3480_v59 = vadd.f32 %v3479_v3, %v3478_v18  ;;  %v3481_v19 = vpop.f32.mrb[110].mxu1  ;;  %v2571_v2 = vpack.c.bf16 %v2550_v56, %v2549_v41 }
 0x32e   :  { %v3482_v42 = vpop.f32.mrb[111].mxu1  ;;  %p4211_p4 = pnand %p4210_p3, %p4204_p0 }
 0x32f   :  { %v2491_v46 = vadd.f32 %v3480_v59, %v5399_v52  ;;  %v3483_v34 = vadd.f32 %v3482_v42, %v3481_v19  ;;  %3568 = vmatprep.mubr.bf16.mxu1 %v2571_v2 }
 0x331   :  { %v2494_v26 = vadd.f32 %v3483_v34, %v5399_v52  ;;  %v2551_v43 = vmax.f32 %v2491_v46, 0.0 }
 0x333   :  { %v2552_v27 = vmax.f32 %v2494_v26, 0.0  ;;  %v3484_v47 = vpop.f32.mrb[112].mxu1 }
 0x334   :  { %v3485_v44 = vpop.f32.mrb[113].mxu1 }
 0x335   :  { %v3486_v20 = vadd.f32 %v3485_v44, %v3484_v47  ;;  %v3487_v48 = vpop.f32.mrb[114].mxu1  ;;  %v2572_v4 = vpack.c.bf16 %v2552_v27, %v2551_v43 }
 0x336   :  { %v3488_v21 = vpop.f32.mrb[115].mxu1 }
 0x337   :  { %v2499_v60 = vadd.f32 %v3486_v20, %v5399_v52  ;;  %v3489_v61 = vadd.f32 %v3488_v21, %v3487_v48  ;;  %3569 = vmatmul.mubr.bf16.gmra.mrb[148].mxu1 %v2572_v4 }
 0x339   :  { %v2502_v11 = vadd.f32 %v3489_v61, %v5399_v52  ;;  %v2553_v5 = vmax.f32 %v2499_v60, 0.0 }
 0x33b   :  { %v2554_v30 = vmax.f32 %v2502_v11, 0.0  ;;  %v3490_v22 = vpop.f32.mrb[116].mxu1 }
 0x33c   :  { %v3491_v31 = vpop.f32.mrb[117].mxu1 }
 0x33d   :  { %v3492_v6 = vadd.f32 %v3491_v31, %v3490_v22  ;;  %v3493_v57 = vpop.f32.mrb[118].mxu1  ;;  %v2573_v36 = vpack.c.bf16 %v2554_v30, %v2553_v5 }
 0x33e   :  { %v3494_v7 = vpop.f32.mrb[119].mxu1 }
 0x33f   :  { %v2507_v8 = vadd.f32 %v3492_v6, %v5399_v52  ;;  %v3495_v49 = vadd.f32 %v3494_v7, %v3493_v57  ;;  %3572 = vmatprep.mubr.bf16.mxu1 %v2573_v36 }
 0x341   :  { %v2510_v29 = vadd.f32 %v3495_v49, %v5399_v52  ;;  %v2555_v37 = vmax.f32 %v2507_v8, 0.0 }
 0x343   :  { %v2556_v23 = vmax.f32 %v2510_v29, 0.0  ;;  %v3496_v50 = vpop.f32.mrb[120].mxu1 }
 0x344   :  { %v3497_v54 = vpop.f32.mrb[121].mxu1 }
 0x345   :  { %v3498_v24 = vadd.f32 %v3497_v54, %v3496_v50  ;;  %v3499_v40 = vpop.f32.mrb[122].mxu1  ;;  %v2574_v51 = vpack.c.bf16 %v2556_v23, %v2555_v37 }
 0x346   :  { %v3500_v9 = vpop.f32.mrb[123].mxu1 }
 0x347   :  { %v2515_v25 = vadd.f32 %v3498_v24, %v5399_v52  ;;  %v3501_v15 = vadd.f32 %v3500_v9, %v3499_v40  ;;  %3573 = vmatmul.mubr.bf16.gmra.mrb[152].mxu1 %v2574_v51 }
 0x349   :  { %v2518_v38 = vadd.f32 %v3501_v15, %v5399_v52  ;;  %v2557_v10 = vmax.f32 %v2515_v25, 0.0 }
 0x34b   :  { %v2558_v53 = vmax.f32 %v2518_v38, 0.0  ;;  %v3502_v63 = vpop.f32.mrb[124].mxu1 }
 0x34c   :  { %v3503_v12 = vpop.f32.mrb[125].mxu1 }
 0x34d   :  { %v3504_v55 = vadd.f32 %v3503_v12, %v3502_v63  ;;  %v3505_v39 = vpop.f32.mrb[126].mxu1  ;;  %v2575_v14 = vpack.c.bf16 %v2558_v53, %v2557_v10 }
 0x34e   :  { %v3506_v45 = vpop.f32.mrb[127].mxu1 }
 0x34f   :  { %v2523_v13 = vadd.f32 %v3504_v55, %v5399_v52  ;;  %v3507_v62 = vadd.f32 %v3506_v45, %v3505_v39  ;;  %3576 = vmatprep.mubr.bf16.mxu1 %v2575_v14 }
 0x351   :  { %v2526_v32 = vadd.f32 %v3507_v62, %v5399_v52  ;;  %v2559_v35 = vmax.f32 %v2523_v13, 0.0 }
 0x353   :  { %v2560_v0 = vmax.f32 %v2526_v32, 0.0 }
 0x355   :  { %v2576_v33 = vpack.c.bf16 %v2560_v0, %v2559_v35 }
 0x357   :  { %3577 = vmatmul.mubr.bf16.gmra.mrb[156].mxu1 %v2576_v33 }
 0x3ba   :  { %v3550_v58 = vpop.f32.mrb[128].mxu1 }
 0x3bb   :  { %v2682_v1 = vpop.f32.mrb[129].mxu1  ;;  %v2691_v17 = vadd.f32 %v3550_v58, %v5436_v16 }
 0x3bc   :  { %v3551_v28 = vpop.f32.mrb[130].mxu1  ;;  %v2683_v18 = vadd.f32 %v5436_v16, %v2682_v1 }
 0x3bd   :  { %v2694_v41 = vadd.f32 %v3551_v28, %v5436_v16  ;;  %v2685_v56 = vpop.f32.mrb[131].mxu1 }
 0x3be   :  { %v2686_v52 = vadd.f32 %v5436_v16, %v2685_v56 }
 0x3bf   :  { %v3309_v3 = vpack.c.bf16 %v2694_v41, %v2691_v17 }
 0x3c0   :  { %v3304_v59 = vpack.c.bf16 %v2686_v52, %v2683_v18 }
 0x3c1   :  { %3381 = vst [vmem:[#allocation2 + $0x8] sm:$0xff] %v3309_v3  }
 0x3c2   :  { %3305 = vst [vmem:[#allocation2] sm:$0xff] %v3304_v59  }
 0x3ca   :  { %v3554_v19 = vpop.f32.mrb[132].mxu1 }
 0x3cb   :  { %v2698_v2 = vpop.f32.mrb[133].mxu1  ;;  %v2707_v46 = vadd.f32 %v3554_v19, %v5436_v16 }
 0x3cc   :  { %v3555_v42 = vpop.f32.mrb[134].mxu1  ;;  %v2699_v43 = vadd.f32 %v5436_v16, %v2698_v2 }
 0x3cd   :  { %v2710_v34 = vadd.f32 %v3555_v42, %v5436_v16  ;;  %v2701_v26 = vpop.f32.mrb[135].mxu1 }
 0x3ce   :  { %v2702_v27 = vadd.f32 %v5436_v16, %v2701_v26 }
 0x3cf   :  { %v3319_v47 = vpack.c.bf16 %v2710_v34, %v2707_v46 }
 0x3d0   :  { %v3314_v44 = vpack.c.bf16 %v2702_v27, %v2699_v43 }
 0x3d1   :  { %3383 = vst [vmem:[#allocation2 + $0x18] sm:$0xff] %v3319_v47  }
 0x3d2   :  { %3382 = vst [vmem:[#allocation2 + $0x10] sm:$0xff] %v3314_v44  }
 0x3da   :  { %v3558_v20 = vpop.f32.mrb[136].mxu1 }
 0x3db   :  { %v2714_v48 = vpop.f32.mrb[137].mxu1  ;;  %v2723_v21 = vadd.f32 %v3558_v20, %v5436_v16 }
 0x3dc   :  { %v3559_v4 = vpop.f32.mrb[138].mxu1  ;;  %v2715_v11 = vadd.f32 %v5436_v16, %v2714_v48 }
 0x3dd   :  { %v2726_v60 = vadd.f32 %v3559_v4, %v5436_v16  ;;  %v2717_v61 = vpop.f32.mrb[139].mxu1 }
 0x3de   :  { %v2718_v5 = vadd.f32 %v5436_v16, %v2717_v61 }
 0x3df   :  { %v3329_v30 = vpack.c.bf16 %v2726_v60, %v2723_v21 }
 0x3e0   :  { %v3324_v22 = vpack.c.bf16 %v2718_v5, %v2715_v11 }
 0x3e1   :  { %3385 = vst [vmem:[#allocation2 + $0x28] sm:$0xff] %v3329_v30  }
 0x3e2   :  { %3384 = vst [vmem:[#allocation2 + $0x20] sm:$0xff] %v3324_v22  }
 0x3ea   :  { %v3562_v31 = vpop.f32.mrb[140].mxu1 }
 0x3eb   :  { %v2730_v6 = vpop.f32.mrb[141].mxu1  ;;  %v2739_v36 = vadd.f32 %v3562_v31, %v5436_v16 }
 0x3ec   :  { %v3563_v57 = vpop.f32.mrb[142].mxu1  ;;  %v2731_v49 = vadd.f32 %v5436_v16, %v2730_v6 }
 0x3ed   :  { %v2742_v7 = vadd.f32 %v3563_v57, %v5436_v16  ;;  %v2733_v8 = vpop.f32.mrb[143].mxu1 }
 0x3ee   :  { %v2734_v29 = vadd.f32 %v5436_v16, %v2733_v8 }
 0x3ef   :  { %v3339_v37 = vpack.c.bf16 %v2742_v7, %v2739_v36 }
 0x3f0   :  { %v3334_v23 = vpack.c.bf16 %v2734_v29, %v2731_v49 }
 0x3f1   :  { %3387 = vst [vmem:[#allocation2 + $0x38] sm:$0xff] %v3339_v37  }
 0x3f2   :  { %3386 = vst [vmem:[#allocation2 + $0x30] sm:$0xff] %v3334_v23  }
 0x3fa   :  { %v3566_v50 = vpop.f32.mrb[144].mxu1 }
 0x3fb   :  { %v2746_v54 = vpop.f32.mrb[145].mxu1  ;;  %v2755_v40 = vadd.f32 %v3566_v50, %v5436_v16 }
 0x3fc   :  { %v3567_v24 = vpop.f32.mrb[146].mxu1  ;;  %v2747_v25 = vadd.f32 %v5436_v16, %v2746_v54 }
 0x3fd   :  { %v2758_v51 = vadd.f32 %v3567_v24, %v5436_v16  ;;  %v2749_v9 = vpop.f32.mrb[147].mxu1 }
 0x3fe   :  { %v2750_v15 = vadd.f32 %v5436_v16, %v2749_v9 }
 0x3ff   :  { %v3349_v38 = vpack.c.bf16 %v2758_v51, %v2755_v40 }
 0x400   :  { %v3344_v10 = vpack.c.bf16 %v2750_v15, %v2747_v25 }
 0x401   :  { %3389 = vst [vmem:[#allocation2 + $0x48] sm:$0xff] %v3349_v38  }
 0x402   :  { %3388 = vst [vmem:[#allocation2 + $0x40] sm:$0xff] %v3344_v10  }
 0x40a   :  { %v3570_v53 = vpop.f32.mrb[148].mxu1 }
 0x40b   :  { %v2762_v63 = vpop.f32.mrb[149].mxu1  ;;  %v2771_v55 = vadd.f32 %v3570_v53, %v5436_v16 }
 0x40c   :  { %v3571_v12 = vpop.f32.mrb[150].mxu1  ;;  %v2763_v45 = vadd.f32 %v5436_v16, %v2762_v63 }
 0x40d   :  { %v2774_v39 = vadd.f32 %v3571_v12, %v5436_v16  ;;  %v2765_v14 = vpop.f32.mrb[151].mxu1 }
 0x40e   :  { %v2766_v13 = vadd.f32 %v5436_v16, %v2765_v14 }
 0x40f   :  { %v3359_v62 = vpack.c.bf16 %v2774_v39, %v2771_v55 }
 0x410   :  { %v3354_v32 = vpack.c.bf16 %v2766_v13, %v2763_v45 }
 0x411   :  { %3391 = vst [vmem:[#allocation2 + $0x58] sm:$0xff] %v3359_v62  }
 0x412   :  { %3390 = vst [vmem:[#allocation2 + $0x50] sm:$0xff] %v3354_v32  }
 0x41a   :  { %v3574_v35 = vpop.f32.mrb[152].mxu1 }
 0x41b   :  { %v2778_v0 = vpop.f32.mrb[153].mxu1  ;;  %v2787_v58 = vadd.f32 %v3574_v35, %v5436_v16 }
 0x41c   :  { %v3575_v33 = vpop.f32.mrb[154].mxu1  ;;  %v2779_v17 = vadd.f32 %v5436_v16, %v2778_v0 }
 0x41d   :  { %v2790_v1 = vadd.f32 %v3575_v33, %v5436_v16  ;;  %v2781_v28 = vpop.f32.mrb[155].mxu1 }
 0x41e   :  { %v2782_v41 = vadd.f32 %v5436_v16, %v2781_v28 }
 0x41f   :  { %v3369_v56 = vpack.c.bf16 %v2790_v1, %v2787_v58 }
 0x420   :  { %v3364_v18 = vpack.c.bf16 %v2782_v41, %v2779_v17 }
 0x421   :  { %3393 = vst [vmem:[#allocation2 + $0x68] sm:$0xff] %v3369_v56  }
 0x422   :  { %3392 = vst [vmem:[#allocation2 + $0x60] sm:$0xff] %v3364_v18  }
 0x42a   :  { %v3578_v52 = vpop.f32.mrb[156].mxu1 }
 0x42b   :  { %v2794_v3 = vpop.f32.mrb[157].mxu1  ;;  %v2803_v19 = vadd.f32 %v3578_v52, %v5436_v16 }
 0x42c   :  { %v3579_v59 = vpop.f32.mrb[158].mxu1  ;;  %v2795_v46 = vadd.f32 %v5436_v16, %v2794_v3 }
 0x42d   :  { %v2806_v2 = vadd.f32 %v3579_v59, %v5436_v16  ;;  %v2797_v42 = vpop.f32.mrb[159].mxu1 }
 0x42e   :  { %v2798_v34 = vadd.f32 %v5436_v16, %v2797_v42 }
 0x42f   :  { %v3379_v26 = vpack.c.bf16 %v2806_v2, %v2803_v19 }
 0x430   :  { %v3374_v43 = vpack.c.bf16 %v2798_v34, %v2795_v46 }
 0x431   :  { %3395 = vst [vmem:[#allocation2 + $0x78] sm:$0xff] %v3379_v26  }
 0x432   :  { %3394 = vst [vmem:[#allocation2 + $0x70] sm:$0xff] %v3374_v43  }
 0x433   :  { %4214 = shalt.err (!%p4211_p4)
}
 0x434   :  { %s4215_s27 = scalar_lea.hbm %s5489_s7, 2048 }
 0x435   :  { %p4216_p5 = scmp.ne.s32.totalorder %s5489_s7, %s4215_s27  ;;  %p4219_p6 = scmp.lt.u32.totalorder %s4215_s27, %s5489_s7 }
 0x437   :  { %p4221_p7 = pnand %p4219_p6, %p4216_p5 }
 0x439   :  { %4224 = shalt.err (!%p4221_p7)
}
 0x43a   :  { %s4229_s2 = smov 64   ;;  %s4230_s8 = smov 4  }
 0x43b   :  { %2980 = dma.vmem_to_hbm [thread:$0]  %s2975_s24, 2048, %s5489_s7, [#allocation3], %s4229_s2, %s4229_s2, %s4230_s8  }
 0x43c   :  { %4225 = dma.done.wait [#allocation3], 2048  }
 0x43d   :  { %4226 = vsyncadd [#allocation3], 4294965248 }
 0x43e   :  { %2984 = vsyncpa [#allocation3], 1 }

</bundles_post_ra>
